<compile_context>
chip_gen: v7x
topology: tpu7x:2x2x1
jax: 0.10.0
libtpu: 0.0.40
codegen_flags: <defaults>
</compile_context>

<pallas_src>
import functools

import jax
import jax.numpy as jnp
import numpy as np
from jax.experimental import pallas as pl
from jax.experimental.pallas import tpu as pltpu


def _round_up(x, m):
    return (x + m - 1) // m * m


def lstm_nextword_kernel(ids_ref, emb_hbm, wih_ref, whh_ref, b_ref,
                         wout_hbm, bout_ref, out_ref,
                         emb_vmem, wout_vmem, sem_e, sem_w,
                         *, seq_len, batch, batch_pad, hidden, embed_dim,
                         tile_n):
    """One vocab tile: fused embedding gather + LSTM recurrence + projection.

    ids_ref:   (B*T,)            int32  SMEM (scalar prefetch), batch-major ids
    emb_hbm:   (V, E)            f32    HBM embedding table (pl.ANY)
    wih_ref:   (E, 4H)           bf16   input->gates weights (g-cols pre-scaled x2)
    whh_ref:   (H, 4H)           bf16   hidden->gates weights (g-cols pre-scaled x2)
    b_ref:     (1, 4H)           f32    b_ih + b_hh (g-cols pre-scaled x2)
    wout_hbm:  (n_tiles, H, TN)  bf16   HBM output projection tiles (pl.ANY)
    bout_ref:  (1, TN)           f32    output bias tile
    out_ref:   (Bp, TN)          f32    logits tile for the last time step
    """
    T, B, Bp, H, E, TN = seq_len, batch, batch_pad, hidden, embed_dim, tile_n
    j = pl.program_id(0)

    # ---- 1. Kick off the W_out tile DMA first; it is hidden behind the whole
    #         recurrence and waited on only right before the final matmul.
    wout_cp = pltpu.make_async_copy(wout_hbm.at[j], wout_vmem, sem_w.at[0])
    wout_cp.start()

    # ---- 2. Fused embedding gather: one row DMA per (t, b) token, all in
    #         flight concurrently.  Indices come from the SMEM prefetch ref.
    # TODO(synk): for long sequences chunk the gathers (bounded in-flight DMAs)
    # and hoist them out of the vocab-tile loop when num_tiles > 1.
    gather_cps = []
    for t in range(T):
        for b in range(B):
            idx = ids_ref[b * T + t]                      # token id (scalar)
            cp = pltpu.make_async_copy(
                emb_hbm.at[pl.ds(idx, 1), :],
                emb_vmem.at[pl.ds(t * Bp + b, 1), :],
                sem_e.at[t, b])
            cp.start()
            gather_cps.append(cp)

    # Zero the padded batch rows (disjoint from the DMA-written rows) while the
    # gathers are in flight, so padded lanes never read stale VMEM.
    if Bp > B:
        for t in range(T):
            emb_vmem[pl.ds(t * Bp + B, Bp - B), :] = jnp.zeros(
                (Bp - B, E), emb_vmem.dtype)

    for cp in gather_cps:
        cp.wait()

    # ---- 3. Hoisted input projection: one batched MXU matmul covering all T
    #         steps, bias folded in (lane-dense 4H output).
    x_bf = emb_vmem[...].astype(jnp.bfloat16)                       # (T*Bp, E)
    xw = jnp.dot(x_bf, wih_ref[...],
                 preferred_element_type=jnp.float32) + b_ref[...]   # (T*Bp, 4H)

    # ---- 4. Unrolled recurrence.  g-gate columns were pre-scaled by 2 in the
    #         wrapper, so a single full-vreg sigmoid gives all four gates via
    #         tanh(x) = 2*sigmoid(2x) - 1  (2 EUP passes/step: sigmoid, tanh(c)).
    # TODO(synk): for T > ~16 stage xw in a VMEM scratch and switch to
    # lax.fori_loop(..., unroll=True) to bound vreg live ranges.
    whh = whh_ref[...]
    h = jnp.zeros((Bp, H), jnp.float32)
    c = jnp.zeros((Bp, H), jnp.float32)
    for t in range(T):
        gates = xw[t * Bp:(t + 1) * Bp, :] + jnp.dot(
            h.astype(jnp.bfloat16), whh, preferred_element_type=jnp.float32)
        sig = jax.nn.sigmoid(gates)                  # single EUP pass, (Bp, 4H)
        i_g = sig[:, 0 * H:1 * H]
        f_g = sig[:, 1 * H:2 * H]
        g_g = 2.0 * sig[:, 2 * H:3 * H] - 1.0        # tanh of the unscaled g gate
        o_g = sig[:, 3 * H:4 * H]
        c = f_g * c + i_g * g_g
        h = o_g * jnp.tanh(c)

    # ---- 5. Output projection for this vocab tile (lane-dense unmasked store).
    wout_cp.wait()
    out_ref[...] = (jnp.dot(h.astype(jnp.bfloat16), wout_vmem[...],
                            preferred_element_type=jnp.float32)
                    + bout_ref[...])


def next_word_predictor(x_ids, params, *, tile_n=2048):
    """Forward pass matching PyTorch NextWordPredictor.forward."""
    emb_table = params["embedding"].astype(jnp.float32)        # (V, E), stays in HBM
    V, E = emb_table.shape
    H = params["w_hh_t"].shape[0]
    B, T = x_ids.shape
    assert (4 * H) % 128 == 0, "gate slicing assumes 4*H is a multiple of 128"

    Bp = max(16, _round_up(B, 16))      # full bf16 sublane pack (16 rows/vreg)
    Vp = _round_up(V, 128)              # lane-dense logits
    TN = min(tile_n, Vp)                # vocab tile width (multiple of 128)
    Vp = _round_up(Vp, TN)
    num_tiles = Vp // TN

    # Gate order (i, f, g, o).  Pre-scale the g columns by 2 (exact in fp) so
    # the kernel evaluates all gates with one sigmoid pass.
    g_scale = jnp.ones((4 * H,), jnp.float32).at[2 * H:3 * H].set(2.0)
    wih = (params["w_ih_t"] * g_scale).astype(jnp.bfloat16)              # (E, 4H)
    whh = (params["w_hh_t"] * g_scale).astype(jnp.bfloat16)              # (H, 4H)
    b_gates = ((params["b_ih"] + params["b_hh"]) * g_scale
               ).reshape(1, 4 * H).astype(jnp.float32)                   # (1, 4H)

    wout = jnp.pad(params["w_out_t"],
                   ((0, 0), (0, Vp - V))).astype(jnp.bfloat16)           # (H, Vp)
    wout_tiles = wout.reshape(H, num_tiles, TN).transpose(1, 0, 2)       # (nt,H,TN)
    bout = jnp.pad(params["b_out"],
                   (0, Vp - V)).reshape(1, Vp).astype(jnp.float32)       # (1, Vp)

    ids_flat = x_ids.reshape(B * T).astype(jnp.int32)                    # (B*T,)

    kernel = functools.partial(lstm_nextword_kernel, seq_len=T, batch=B,
                               batch_pad=Bp, hidden=H, embed_dim=E, tile_n=TN)

    grid_spec = pltpu.PrefetchScalarGridSpec(
        num_scalar_prefetch=1,
        grid=(num_tiles,),
        in_specs=[
            pl.BlockSpec(memory_space=pl.ANY),                      # embedding (HBM)
            pl.BlockSpec((E, 4 * H), lambda j, ids: (0, 0)),        # W_ih
            pl.BlockSpec((H, 4 * H), lambda j, ids: (0, 0)),        # W_hh
            pl.BlockSpec((1, 4 * H), lambda j, ids: (0, 0)),        # gate bias
            pl.BlockSpec(memory_space=pl.ANY),                      # W_out (HBM)
            pl.BlockSpec((1, TN), lambda j, ids: (0, j)),           # b_out tile
        ],
        out_specs=pl.BlockSpec((Bp, TN), lambda j, ids: (0, j)),
        scratch_shapes=[
            pltpu.VMEM((T * Bp, E), jnp.float32),       # gathered embeddings
            pltpu.VMEM((H, TN), jnp.bfloat16),          # W_out tile
            pltpu.SemaphoreType.DMA((T, B)),            # per-row gather sems
            pltpu.SemaphoreType.DMA((1,)),              # W_out tile sem
        ],
    )

    logits_pad = pl.pallas_call(
        kernel,
        out_shape=jax.ShapeDtypeStruct((Bp, Vp), jnp.float32),
        grid_spec=grid_spec,
        compiler_params=pltpu.CompilerParams(
            dimension_semantics=("parallel",)),
    )(ids_flat, emb_table, wih, whh, b_gates, wout_tiles, bout)

    return logits_pad[:B, :V]


def reference_forward(x_ids, params):
    """Pure-JAX f32 reference mirroring torch semantics (for validation)."""
    emb = params["embedding"][x_ids].astype(jnp.float32)   # (B, T, E)
    B, T, E = emb.shape
    H = params["w_hh_t"].shape[0]
    h = jnp.zeros((B, H), jnp.float32)
    c = jnp.zeros((B, H), jnp.float32)
    for t in range(T):
        gates = (emb[:, t, :] @ params["w_ih_t"]
                 + h @ params["w_hh_t"]
                 + params["b_ih"] + params["b_hh"])
        i_g = jax.nn.sigmoid(gates[:, 0 * H:1 * H])
        f_g = jax.nn.sigmoid(gates[:, 1 * H:2 * H])
        g_g = jnp.tanh(gates[:, 2 * H:3 * H])
        o_g = jax.nn.sigmoid(gates[:, 3 * H:4 * H])
        c = f_g * c + i_g * g_g
        h = o_g * jnp.tanh(c)
    return h @ params["w_out_t"] + params["b_out"]


def init_params(key, vocab_size, embed_dim, hidden_size):
    """Deterministic synthetic init (PyTorch-style shapes, stored transposed)."""
    ks = jax.random.split(key, 8)
    k = 1.0 / np.sqrt(hidden_size)
    u = functools.partial(jax.random.uniform, minval=-k, maxval=k,
                          dtype=jnp.float32)
    return {
        "embedding": jax.random.normal(ks[0], (vocab_size, embed_dim),
                                       jnp.float32),
        "w_ih_t": u(ks[1], (embed_dim, 4 * hidden_size)),
        "w_hh_t": u(ks[2], (hidden_size, 4 * hidden_size)),
        "b_ih": u(ks[3], (4 * hidden_size,)),
        "b_hh": u(ks[4], (4 * hidden_size,)),
        "w_out_t": u(ks[5], (hidden_size, vocab_size)),
        "b_out": u(ks[6], (vocab_size,)),
    }


if __name__ == "__main__":
    VOCAB, EMBED, HIDDEN = 64, 32, 32
    BATCH, SEQ = 2, 8

    key = jax.random.PRNGKey(0)
    pkey, xkey = jax.random.split(key)
    params = init_params(pkey, VOCAB, EMBED, HIDDEN)
    x_ids = jax.random.randint(xkey, (BATCH, SEQ), 0, VOCAB, dtype=jnp.int32)

    logits = next_word_predictor(x_ids, params)
    logits = jax.block_until_ready(logits)

    ref = reference_forward(x_ids, params)
    assert logits.shape == (BATCH, VOCAB)
    # bf16 weights with f32 accumulation vs. f32 reference -> looser tolerance.
    np.testing.assert_allclose(np.asarray(logits), np.asarray(ref),
                               rtol=2e-2, atol=2e-2)
    print("KERNEL_OK")
</pallas_src>

<mosaic_0001>
module attributes {stable_mosaic.version = 11 : i64} {
  func.func @lstm_nextword_kernel(%arg0: i32, %arg1: memref<16xi32, #tpu.memory_space<smem>>, %arg2: memref<64x32xf32, #tpu.memory_space<any>>, %arg3: memref<32x128xbf16, #tpu.memory_space<vmem>>, %arg4: memref<32x128xbf16, #tpu.memory_space<vmem>>, %arg5: memref<1x128xf32, #tpu.memory_space<vmem>>, %arg6: memref<1x32x128xbf16, #tpu.memory_space<any>>, %arg7: memref<1x128xf32, #tpu.memory_space<vmem>>, %arg8: memref<16x128xf32, #tpu.memory_space<vmem>>, %arg9: memref<128x32xf32, #tpu.memory_space<vmem>>, %arg10: memref<32x128xbf16, #tpu.memory_space<vmem>>, %arg11: memref<8x2x!tpu.dma_semaphore, #tpu.memory_space<semaphore_mem>>, %arg12: memref<1x!tpu.dma_semaphore, #tpu.memory_space<semaphore_mem>>) attributes {dimension_semantics = [#tpu.dimension_semantics<parallel>], iteration_bounds = array<i64: 1>, scalar_prefetch = 1 : i64, scratch_operands = 4 : i64, tpu.core_type = #tpu.core_type<tc>, window_params = [{}, {pipeline_mode = #tpu.pipeline_mode<synchronous>, transform_indices = @transform_1, window_bounds = array<i64: 32, 128>}, {pipeline_mode = #tpu.pipeline_mode<synchronous>, transform_indices = @transform_2, window_bounds = array<i64: 32, 128>}, {pipeline_mode = #tpu.pipeline_mode<synchronous>, transform_indices = @transform_3, window_bounds = array<i64: 1, 128>}, {}, {transform_indices = @transform_5, window_bounds = array<i64: 1, 128>}, {transform_indices = @transform_6, window_bounds = array<i64: 16, 128>}]} {
    %c0_i32 = arith.constant 0 : i32
    %c0_i32_0 = arith.constant 0 : i32
    %c0_i32_1 = arith.constant 0 : i32
    %0 = tpu.memref_slice %arg6[%arg0, %c0_i32_0, %c0_i32_1] : memref<1x32x128xbf16, #tpu.memory_space<any>> -> memref<1x32x128xbf16, #tpu.memory_space<any>>
    %1 = tpu.memref_squeeze %0 : memref<1x32x128xbf16, #tpu.memory_space<any>> -> memref<32x128xbf16, #tpu.memory_space<any>>
    %2 = tpu.memref_slice %arg12[%c0_i32] : memref<1x!tpu.dma_semaphore, #tpu.memory_space<semaphore_mem>> -> memref<1x!tpu.dma_semaphore, #tpu.memory_space<semaphore_mem>>
    %3 = tpu.memref_squeeze %2 : memref<1x!tpu.dma_semaphore, #tpu.memory_space<semaphore_mem>> -> memref<!tpu.dma_semaphore, #tpu.memory_space<semaphore_mem>>
    tpu.enqueue_dma source(%1 : memref<32x128xbf16, #tpu.memory_space<any>>) target(%arg10 : memref<32x128xbf16, #tpu.memory_space<vmem>>) target_semaphore(%3 : memref<!tpu.dma_semaphore, #tpu.memory_space<semaphore_mem>>)
    %c0 = arith.constant 0 : index
    %4 = memref.load %arg1[%c0] : memref<16xi32, #tpu.memory_space<smem>>
    %c0_i32_2 = arith.constant 0 : i32
    %c0_i32_3 = arith.constant 0 : i32
    %c0_i32_4 = arith.constant 0 : i32
    %5 = tpu.memref_slice %arg2[%4, %c0_i32_4] : memref<64x32xf32, #tpu.memory_space<any>> -> memref<1x32xf32, #tpu.memory_space<any>>
    %c0_i32_5 = arith.constant 0 : i32
    %c0_i32_6 = arith.constant 0 : i32
    %6 = tpu.memref_slice %arg9[%c0_i32_5, %c0_i32_6] : memref<128x32xf32, #tpu.memory_space<vmem>> -> memref<1x32xf32, #tpu.memory_space<vmem>>
    %7 = tpu.memref_slice %arg11[%c0_i32_2, %c0_i32_3] : memref<8x2x!tpu.dma_semaphore, #tpu.memory_space<semaphore_mem>> -> memref<1x1x!tpu.dma_semaphore, #tpu.memory_space<semaphore_mem>>
    %8 = tpu.memref_squeeze %7 : memref<1x1x!tpu.dma_semaphore, #tpu.memory_space<semaphore_mem>> -> memref<!tpu.dma_semaphore, #tpu.memory_space<semaphore_mem>>
    tpu.enqueue_dma source(%5 : memref<1x32xf32, #tpu.memory_space<any>>) target(%6 : memref<1x32xf32, #tpu.memory_space<vmem>>) target_semaphore(%8 : memref<!tpu.dma_semaphore, #tpu.memory_space<semaphore_mem>>)
    %c8 = arith.constant 8 : index
    %9 = memref.load %arg1[%c8] : memref<16xi32, #tpu.memory_space<smem>>
    %c0_i32_7 = arith.constant 0 : i32
    %c1_i32 = arith.constant 1 : i32
    %c0_i32_8 = arith.constant 0 : i32
    %10 = tpu.memref_slice %arg2[%9, %c0_i32_8] : memref<64x32xf32, #tpu.memory_space<any>> -> memref<1x32xf32, #tpu.memory_space<any>>
    %c1_i32_9 = arith.constant 1 : i32
    %c0_i32_10 = arith.constant 0 : i32
    %11 = tpu.memref_slice %arg9[%c1_i32_9, %c0_i32_10] : memref<128x32xf32, #tpu.memory_space<vmem>> -> memref<1x32xf32, #tpu.memory_space<vmem>>
    %12 = tpu.memref_slice %arg11[%c0_i32_7, %c1_i32] : memref<8x2x!tpu.dma_semaphore, #tpu.memory_space<semaphore_mem>> -> memref<1x1x!tpu.dma_semaphore, #tpu.memory_space<semaphore_mem>>
    %13 = tpu.memref_squeeze %12 : memref<1x1x!tpu.dma_semaphore, #tpu.memory_space<semaphore_mem>> -> memref<!tpu.dma_semaphore, #tpu.memory_space<semaphore_mem>>
    tpu.enqueue_dma source(%10 : memref<1x32xf32, #tpu.memory_space<any>>) target(%11 : memref<1x32xf32, #tpu.memory_space<vmem>>) target_semaphore(%13 : memref<!tpu.dma_semaphore, #tpu.memory_space<semaphore_mem>>)
    %c1 = arith.constant 1 : index
    %14 = memref.load %arg1[%c1] : memref<16xi32, #tpu.memory_space<smem>>
    %c1_i32_11 = arith.constant 1 : i32
    %c0_i32_12 = arith.constant 0 : i32
    %c0_i32_13 = arith.constant 0 : i32
    %15 = tpu.memref_slice %arg2[%14, %c0_i32_13] : memref<64x32xf32, #tpu.memory_space<any>> -> memref<1x32xf32, #tpu.memory_space<any>>
    %c16_i32 = arith.constant 16 : i32
    %c0_i32_14 = arith.constant 0 : i32
    %16 = tpu.memref_slice %arg9[%c16_i32, %c0_i32_14] : memref<128x32xf32, #tpu.memory_space<vmem>> -> memref<1x32xf32, #tpu.memory_space<vmem>>
    %17 = tpu.memref_slice %arg11[%c1_i32_11, %c0_i32_12] : memref<8x2x!tpu.dma_semaphore, #tpu.memory_space<semaphore_mem>> -> memref<1x1x!tpu.dma_semaphore, #tpu.memory_space<semaphore_mem>>
    %18 = tpu.memref_squeeze %17 : memref<1x1x!tpu.dma_semaphore, #tpu.memory_space<semaphore_mem>> -> memref<!tpu.dma_semaphore, #tpu.memory_space<semaphore_mem>>
    tpu.enqueue_dma source(%15 : memref<1x32xf32, #tpu.memory_space<any>>) target(%16 : memref<1x32xf32, #tpu.memory_space<vmem>>) target_semaphore(%18 : memref<!tpu.dma_semaphore, #tpu.memory_space<semaphore_mem>>)
    %c9 = arith.constant 9 : index
    %19 = memref.load %arg1[%c9] : memref<16xi32, #tpu.memory_space<smem>>
    %c1_i32_15 = arith.constant 1 : i32
    %c1_i32_16 = arith.constant 1 : i32
    %c0_i32_17 = arith.constant 0 : i32
    %20 = tpu.memref_slice %arg2[%19, %c0_i32_17] : memref<64x32xf32, #tpu.memory_space<any>> -> memref<1x32xf32, #tpu.memory_space<any>>
    %c17_i32 = arith.constant 17 : i32
    %c0_i32_18 = arith.constant 0 : i32
    %21 = tpu.memref_slice %arg9[%c17_i32, %c0_i32_18] : memref<128x32xf32, #tpu.memory_space<vmem>> -> memref<1x32xf32, #tpu.memory_space<vmem>>
    %22 = tpu.memref_slice %arg11[%c1_i32_15, %c1_i32_16] : memref<8x2x!tpu.dma_semaphore, #tpu.memory_space<semaphore_mem>> -> memref<1x1x!tpu.dma_semaphore, #tpu.memory_space<semaphore_mem>>
    %23 = tpu.memref_squeeze %22 : memref<1x1x!tpu.dma_semaphore, #tpu.memory_space<semaphore_mem>> -> memref<!tpu.dma_semaphore, #tpu.memory_space<semaphore_mem>>
    tpu.enqueue_dma source(%20 : memref<1x32xf32, #tpu.memory_space<any>>) target(%21 : memref<1x32xf32, #tpu.memory_space<vmem>>) target_semaphore(%23 : memref<!tpu.dma_semaphore, #tpu.memory_space<semaphore_mem>>)
    %c2 = arith.constant 2 : index
    %24 = memref.load %arg1[%c2] : memref<16xi32, #tpu.memory_space<smem>>
    %c2_i32 = arith.constant 2 : i32
    %c0_i32_19 = arith.constant 0 : i32
    %c0_i32_20 = arith.constant 0 : i32
    %25 = tpu.memref_slice %arg2[%24, %c0_i32_20] : memref<64x32xf32, #tpu.memory_space<any>> -> memref<1x32xf32, #tpu.memory_space<any>>
    %c32_i32 = arith.constant 32 : i32
    %c0_i32_21 = arith.constant 0 : i32
    %26 = tpu.memref_slice %arg9[%c32_i32, %c0_i32_21] : memref<128x32xf32, #tpu.memory_space<vmem>> -> memref<1x32xf32, #tpu.memory_space<vmem>>
    %27 = tpu.memref_slice %arg11[%c2_i32, %c0_i32_19] : memref<8x2x!tpu.dma_semaphore, #tpu.memory_space<semaphore_mem>> -> memref<1x1x!tpu.dma_semaphore, #tpu.memory_space<semaphore_mem>>
    %28 = tpu.memref_squeeze %27 : memref<1x1x!tpu.dma_semaphore, #tpu.memory_space<semaphore_mem>> -> memref<!tpu.dma_semaphore, #tpu.memory_space<semaphore_mem>>
    tpu.enqueue_dma source(%25 : memref<1x32xf32, #tpu.memory_space<any>>) target(%26 : memref<1x32xf32, #tpu.memory_space<vmem>>) target_semaphore(%28 : memref<!tpu.dma_semaphore, #tpu.memory_space<semaphore_mem>>)
    %c10 = arith.constant 10 : index
    %29 = memref.load %arg1[%c10] : memref<16xi32, #tpu.memory_space<smem>>
    %c2_i32_22 = arith.constant 2 : i32
    %c1_i32_23 = arith.constant 1 : i32
    %c0_i32_24 = arith.constant 0 : i32
    %30 = tpu.memref_slice %arg2[%29, %c0_i32_24] : memref<64x32xf32, #tpu.memory_space<any>> -> memref<1x32xf32, #tpu.memory_space<any>>
    %c33_i32 = arith.constant 33 : i32
    %c0_i32_25 = arith.constant 0 : i32
    %31 = tpu.memref_slice %arg9[%c33_i32, %c0_i32_25] : memref<128x32xf32, #tpu.memory_space<vmem>> -> memref<1x32xf32, #tpu.memory_space<vmem>>
    %32 = tpu.memref_slice %arg11[%c2_i32_22, %c1_i32_23] : memref<8x2x!tpu.dma_semaphore, #tpu.memory_space<semaphore_mem>> -> memref<1x1x!tpu.dma_semaphore, #tpu.memory_space<semaphore_mem>>
    %33 = tpu.memref_squeeze %32 : memref<1x1x!tpu.dma_semaphore, #tpu.memory_space<semaphore_mem>> -> memref<!tpu.dma_semaphore, #tpu.memory_space<semaphore_mem>>
    tpu.enqueue_dma source(%30 : memref<1x32xf32, #tpu.memory_space<any>>) target(%31 : memref<1x32xf32, #tpu.memory_space<vmem>>) target_semaphore(%33 : memref<!tpu.dma_semaphore, #tpu.memory_space<semaphore_mem>>)
    %c3 = arith.constant 3 : index
    %34 = memref.load %arg1[%c3] : memref<16xi32, #tpu.memory_space<smem>>
    %c3_i32 = arith.constant 3 : i32
    %c0_i32_26 = arith.constant 0 : i32
    %c0_i32_27 = arith.constant 0 : i32
    %35 = tpu.memref_slice %arg2[%34, %c0_i32_27] : memref<64x32xf32, #tpu.memory_space<any>> -> memref<1x32xf32, #tpu.memory_space<any>>
    %c48_i32 = arith.constant 48 : i32
    %c0_i32_28 = arith.constant 0 : i32
    %36 = tpu.memref_slice %arg9[%c48_i32, %c0_i32_28] : memref<128x32xf32, #tpu.memory_space<vmem>> -> memref<1x32xf32, #tpu.memory_space<vmem>>
    %37 = tpu.memref_slice %arg11[%c3_i32, %c0_i32_26] : memref<8x2x!tpu.dma_semaphore, #tpu.memory_space<semaphore_mem>> -> memref<1x1x!tpu.dma_semaphore, #tpu.memory_space<semaphore_mem>>
    %38 = tpu.memref_squeeze %37 : memref<1x1x!tpu.dma_semaphore, #tpu.memory_space<semaphore_mem>> -> memref<!tpu.dma_semaphore, #tpu.memory_space<semaphore_mem>>
    tpu.enqueue_dma source(%35 : memref<1x32xf32, #tpu.memory_space<any>>) target(%36 : memref<1x32xf32, #tpu.memory_space<vmem>>) target_semaphore(%38 : memref<!tpu.dma_semaphore, #tpu.memory_space<semaphore_mem>>)
    %c11 = arith.constant 11 : index
    %39 = memref.load %arg1[%c11] : memref<16xi32, #tpu.memory_space<smem>>
    %c3_i32_29 = arith.constant 3 : i32
    %c1_i32_30 = arith.constant 1 : i32
    %c0_i32_31 = arith.constant 0 : i32
    %40 = tpu.memref_slice %arg2[%39, %c0_i32_31] : memref<64x32xf32, #tpu.memory_space<any>> -> memref<1x32xf32, #tpu.memory_space<any>>
    %c49_i32 = arith.constant 49 : i32
    %c0_i32_32 = arith.constant 0 : i32
    %41 = tpu.memref_slice %arg9[%c49_i32, %c0_i32_32] : memref<128x32xf32, #tpu.memory_space<vmem>> -> memref<1x32xf32, #tpu.memory_space<vmem>>
    %42 = tpu.memref_slice %arg11[%c3_i32_29, %c1_i32_30] : memref<8x2x!tpu.dma_semaphore, #tpu.memory_space<semaphore_mem>> -> memref<1x1x!tpu.dma_semaphore, #tpu.memory_space<semaphore_mem>>
    %43 = tpu.memref_squeeze %42 : memref<1x1x!tpu.dma_semaphore, #tpu.memory_space<semaphore_mem>> -> memref<!tpu.dma_semaphore, #tpu.memory_space<semaphore_mem>>
    tpu.enqueue_dma source(%40 : memref<1x32xf32, #tpu.memory_space<any>>) target(%41 : memref<1x32xf32, #tpu.memory_space<vmem>>) target_semaphore(%43 : memref<!tpu.dma_semaphore, #tpu.memory_space<semaphore_mem>>)
    %c4 = arith.constant 4 : index
    %44 = memref.load %arg1[%c4] : memref<16xi32, #tpu.memory_space<smem>>
    %c4_i32 = arith.constant 4 : i32
    %c0_i32_33 = arith.constant 0 : i32
    %c0_i32_34 = arith.constant 0 : i32
    %45 = tpu.memref_slice %arg2[%44, %c0_i32_34] : memref<64x32xf32, #tpu.memory_space<any>> -> memref<1x32xf32, #tpu.memory_space<any>>
    %c64_i32 = arith.constant 64 : i32
    %c0_i32_35 = arith.constant 0 : i32
    %46 = tpu.memref_slice %arg9[%c64_i32, %c0_i32_35] : memref<128x32xf32, #tpu.memory_space<vmem>> -> memref<1x32xf32, #tpu.memory_space<vmem>>
    %47 = tpu.memref_slice %arg11[%c4_i32, %c0_i32_33] : memref<8x2x!tpu.dma_semaphore, #tpu.memory_space<semaphore_mem>> -> memref<1x1x!tpu.dma_semaphore, #tpu.memory_space<semaphore_mem>>
    %48 = tpu.memref_squeeze %47 : memref<1x1x!tpu.dma_semaphore, #tpu.memory_space<semaphore_mem>> -> memref<!tpu.dma_semaphore, #tpu.memory_space<semaphore_mem>>
    tpu.enqueue_dma source(%45 : memref<1x32xf32, #tpu.memory_space<any>>) target(%46 : memref<1x32xf32, #tpu.memory_space<vmem>>) target_semaphore(%48 : memref<!tpu.dma_semaphore, #tpu.memory_space<semaphore_mem>>)
    %c12 = arith.constant 12 : index
    %49 = memref.load %arg1[%c12] : memref<16xi32, #tpu.memory_space<smem>>
    %c4_i32_36 = arith.constant 4 : i32
    %c1_i32_37 = arith.constant 1 : i32
    %c0_i32_38 = arith.constant 0 : i32
    %50 = tpu.memref_slice %arg2[%49, %c0_i32_38] : memref<64x32xf32, #tpu.memory_space<any>> -> memref<1x32xf32, #tpu.memory_space<any>>
    %c65_i32 = arith.constant 65 : i32
    %c0_i32_39 = arith.constant 0 : i32
    %51 = tpu.memref_slice %arg9[%c65_i32, %c0_i32_39] : memref<128x32xf32, #tpu.memory_space<vmem>> -> memref<1x32xf32, #tpu.memory_space<vmem>>
    %52 = tpu.memref_slice %arg11[%c4_i32_36, %c1_i32_37] : memref<8x2x!tpu.dma_semaphore, #tpu.memory_space<semaphore_mem>> -> memref<1x1x!tpu.dma_semaphore, #tpu.memory_space<semaphore_mem>>
    %53 = tpu.memref_squeeze %52 : memref<1x1x!tpu.dma_semaphore, #tpu.memory_space<semaphore_mem>> -> memref<!tpu.dma_semaphore, #tpu.memory_space<semaphore_mem>>
    tpu.enqueue_dma source(%50 : memref<1x32xf32, #tpu.memory_space<any>>) target(%51 : memref<1x32xf32, #tpu.memory_space<vmem>>) target_semaphore(%53 : memref<!tpu.dma_semaphore, #tpu.memory_space<semaphore_mem>>)
    %c5 = arith.constant 5 : index
    %54 = memref.load %arg1[%c5] : memref<16xi32, #tpu.memory_space<smem>>
    %c5_i32 = arith.constant 5 : i32
    %c0_i32_40 = arith.constant 0 : i32
    %c0_i32_41 = arith.constant 0 : i32
    %55 = tpu.memref_slice %arg2[%54, %c0_i32_41] : memref<64x32xf32, #tpu.memory_space<any>> -> memref<1x32xf32, #tpu.memory_space<any>>
    %c80_i32 = arith.constant 80 : i32
    %c0_i32_42 = arith.constant 0 : i32
    %56 = tpu.memref_slice %arg9[%c80_i32, %c0_i32_42] : memref<128x32xf32, #tpu.memory_space<vmem>> -> memref<1x32xf32, #tpu.memory_space<vmem>>
    %57 = tpu.memref_slice %arg11[%c5_i32, %c0_i32_40] : memref<8x2x!tpu.dma_semaphore, #tpu.memory_space<semaphore_mem>> -> memref<1x1x!tpu.dma_semaphore, #tpu.memory_space<semaphore_mem>>
    %58 = tpu.memref_squeeze %57 : memref<1x1x!tpu.dma_semaphore, #tpu.memory_space<semaphore_mem>> -> memref<!tpu.dma_semaphore, #tpu.memory_space<semaphore_mem>>
    tpu.enqueue_dma source(%55 : memref<1x32xf32, #tpu.memory_space<any>>) target(%56 : memref<1x32xf32, #tpu.memory_space<vmem>>) target_semaphore(%58 : memref<!tpu.dma_semaphore, #tpu.memory_space<semaphore_mem>>)
    %c13 = arith.constant 13 : index
    %59 = memref.load %arg1[%c13] : memref<16xi32, #tpu.memory_space<smem>>
    %c5_i32_43 = arith.constant 5 : i32
    %c1_i32_44 = arith.constant 1 : i32
    %c0_i32_45 = arith.constant 0 : i32
    %60 = tpu.memref_slice %arg2[%59, %c0_i32_45] : memref<64x32xf32, #tpu.memory_space<any>> -> memref<1x32xf32, #tpu.memory_space<any>>
    %c81_i32 = arith.constant 81 : i32
    %c0_i32_46 = arith.constant 0 : i32
    %61 = tpu.memref_slice %arg9[%c81_i32, %c0_i32_46] : memref<128x32xf32, #tpu.memory_space<vmem>> -> memref<1x32xf32, #tpu.memory_space<vmem>>
    %62 = tpu.memref_slice %arg11[%c5_i32_43, %c1_i32_44] : memref<8x2x!tpu.dma_semaphore, #tpu.memory_space<semaphore_mem>> -> memref<1x1x!tpu.dma_semaphore, #tpu.memory_space<semaphore_mem>>
    %63 = tpu.memref_squeeze %62 : memref<1x1x!tpu.dma_semaphore, #tpu.memory_space<semaphore_mem>> -> memref<!tpu.dma_semaphore, #tpu.memory_space<semaphore_mem>>
    tpu.enqueue_dma source(%60 : memref<1x32xf32, #tpu.memory_space<any>>) target(%61 : memref<1x32xf32, #tpu.memory_space<vmem>>) target_semaphore(%63 : memref<!tpu.dma_semaphore, #tpu.memory_space<semaphore_mem>>)
    %c6 = arith.constant 6 : index
    %64 = memref.load %arg1[%c6] : memref<16xi32, #tpu.memory_space<smem>>
    %c6_i32 = arith.constant 6 : i32
    %c0_i32_47 = arith.constant 0 : i32
    %c0_i32_48 = arith.constant 0 : i32
    %65 = tpu.memref_slice %arg2[%64, %c0_i32_48] : memref<64x32xf32, #tpu.memory_space<any>> -> memref<1x32xf32, #tpu.memory_space<any>>
    %c96_i32 = arith.constant 96 : i32
    %c0_i32_49 = arith.constant 0 : i32
    %66 = tpu.memref_slice %arg9[%c96_i32, %c0_i32_49] : memref<128x32xf32, #tpu.memory_space<vmem>> -> memref<1x32xf32, #tpu.memory_space<vmem>>
    %67 = tpu.memref_slice %arg11[%c6_i32, %c0_i32_47] : memref<8x2x!tpu.dma_semaphore, #tpu.memory_space<semaphore_mem>> -> memref<1x1x!tpu.dma_semaphore, #tpu.memory_space<semaphore_mem>>
    %68 = tpu.memref_squeeze %67 : memref<1x1x!tpu.dma_semaphore, #tpu.memory_space<semaphore_mem>> -> memref<!tpu.dma_semaphore, #tpu.memory_space<semaphore_mem>>
    tpu.enqueue_dma source(%65 : memref<1x32xf32, #tpu.memory_space<any>>) target(%66 : memref<1x32xf32, #tpu.memory_space<vmem>>) target_semaphore(%68 : memref<!tpu.dma_semaphore, #tpu.memory_space<semaphore_mem>>)
    %c14 = arith.constant 14 : index
    %69 = memref.load %arg1[%c14] : memref<16xi32, #tpu.memory_space<smem>>
    %c6_i32_50 = arith.constant 6 : i32
    %c1_i32_51 = arith.constant 1 : i32
    %c0_i32_52 = arith.constant 0 : i32
    %70 = tpu.memref_slice %arg2[%69, %c0_i32_52] : memref<64x32xf32, #tpu.memory_space<any>> -> memref<1x32xf32, #tpu.memory_space<any>>
    %c97_i32 = arith.constant 97 : i32
    %c0_i32_53 = arith.constant 0 : i32
    %71 = tpu.memref_slice %arg9[%c97_i32, %c0_i32_53] : memref<128x32xf32, #tpu.memory_space<vmem>> -> memref<1x32xf32, #tpu.memory_space<vmem>>
    %72 = tpu.memref_slice %arg11[%c6_i32_50, %c1_i32_51] : memref<8x2x!tpu.dma_semaphore, #tpu.memory_space<semaphore_mem>> -> memref<1x1x!tpu.dma_semaphore, #tpu.memory_space<semaphore_mem>>
    %73 = tpu.memref_squeeze %72 : memref<1x1x!tpu.dma_semaphore, #tpu.memory_space<semaphore_mem>> -> memref<!tpu.dma_semaphore, #tpu.memory_space<semaphore_mem>>
    tpu.enqueue_dma source(%70 : memref<1x32xf32, #tpu.memory_space<any>>) target(%71 : memref<1x32xf32, #tpu.memory_space<vmem>>) target_semaphore(%73 : memref<!tpu.dma_semaphore, #tpu.memory_space<semaphore_mem>>)
    %c7 = arith.constant 7 : index
    %74 = memref.load %arg1[%c7] : memref<16xi32, #tpu.memory_space<smem>>
    %c7_i32 = arith.constant 7 : i32
    %c0_i32_54 = arith.constant 0 : i32
    %c0_i32_55 = arith.constant 0 : i32
    %75 = tpu.memref_slice %arg2[%74, %c0_i32_55] : memref<64x32xf32, #tpu.memory_space<any>> -> memref<1x32xf32, #tpu.memory_space<any>>
    %c112_i32 = arith.constant 112 : i32
    %c0_i32_56 = arith.constant 0 : i32
    %76 = tpu.memref_slice %arg9[%c112_i32, %c0_i32_56] : memref<128x32xf32, #tpu.memory_space<vmem>> -> memref<1x32xf32, #tpu.memory_space<vmem>>
    %77 = tpu.memref_slice %arg11[%c7_i32, %c0_i32_54] : memref<8x2x!tpu.dma_semaphore, #tpu.memory_space<semaphore_mem>> -> memref<1x1x!tpu.dma_semaphore, #tpu.memory_space<semaphore_mem>>
    %78 = tpu.memref_squeeze %77 : memref<1x1x!tpu.dma_semaphore, #tpu.memory_space<semaphore_mem>> -> memref<!tpu.dma_semaphore, #tpu.memory_space<semaphore_mem>>
    tpu.enqueue_dma source(%75 : memref<1x32xf32, #tpu.memory_space<any>>) target(%76 : memref<1x32xf32, #tpu.memory_space<vmem>>) target_semaphore(%78 : memref<!tpu.dma_semaphore, #tpu.memory_space<semaphore_mem>>)
    %c15 = arith.constant 15 : index
    %79 = memref.load %arg1[%c15] : memref<16xi32, #tpu.memory_space<smem>>
    %c7_i32_57 = arith.constant 7 : i32
    %c1_i32_58 = arith.constant 1 : i32
    %c0_i32_59 = arith.constant 0 : i32
    %80 = tpu.memref_slice %arg2[%79, %c0_i32_59] : memref<64x32xf32, #tpu.memory_space<any>> -> memref<1x32xf32, #tpu.memory_space<any>>
    %c113_i32 = arith.constant 113 : i32
    %c0_i32_60 = arith.constant 0 : i32
    %81 = tpu.memref_slice %arg9[%c113_i32, %c0_i32_60] : memref<128x32xf32, #tpu.memory_space<vmem>> -> memref<1x32xf32, #tpu.memory_space<vmem>>
    %82 = tpu.memref_slice %arg11[%c7_i32_57, %c1_i32_58] : memref<8x2x!tpu.dma_semaphore, #tpu.memory_space<semaphore_mem>> -> memref<1x1x!tpu.dma_semaphore, #tpu.memory_space<semaphore_mem>>
    %83 = tpu.memref_squeeze %82 : memref<1x1x!tpu.dma_semaphore, #tpu.memory_space<semaphore_mem>> -> memref<!tpu.dma_semaphore, #tpu.memory_space<semaphore_mem>>
    tpu.enqueue_dma source(%80 : memref<1x32xf32, #tpu.memory_space<any>>) target(%81 : memref<1x32xf32, #tpu.memory_space<vmem>>) target_semaphore(%83 : memref<!tpu.dma_semaphore, #tpu.memory_space<semaphore_mem>>)
    %cst = arith.constant 0.000000e+00 : f32
    %84 = vector.broadcast %cst : f32 to vector<14x32xf32>
    %c2_61 = arith.constant 2 : index
    %c0_62 = arith.constant 0 : index
    %85 = vector.load %arg9[%c2_61, %c0_62] : memref<128x32xf32, #tpu.memory_space<vmem>>, vector<14x32xf32>
    tpu.vector_store %arg9[%c2_61, %c0_62], %84 {strides = array<i32>} : memref<128x32xf32, #tpu.memory_space<vmem>>, vector<14x32xf32>,
    %cst_63 = arith.constant 0.000000e+00 : f32
    %86 = vector.broadcast %cst_63 : f32 to vector<14x32xf32>
    %c18 = arith.constant 18 : index
    %c0_64 = arith.constant 0 : index
    %87 = vector.load %arg9[%c18, %c0_64] : memref<128x32xf32, #tpu.memory_space<vmem>>, vector<14x32xf32>
    tpu.vector_store %arg9[%c18, %c0_64], %86 {strides = array<i32>} : memref<128x32xf32, #tpu.memory_space<vmem>>, vector<14x32xf32>,
    %cst_65 = arith.constant 0.000000e+00 : f32
    %88 = vector.broadcast %cst_65 : f32 to vector<14x32xf32>
    %c34 = arith.constant 34 : index
    %c0_66 = arith.constant 0 : index
    %89 = vector.load %arg9[%c34, %c0_66] : memref<128x32xf32, #tpu.memory_space<vmem>>, vector<14x32xf32>
    tpu.vector_store %arg9[%c34, %c0_66], %88 {strides = array<i32>} : memref<128x32xf32, #tpu.memory_space<vmem>>, vector<14x32xf32>,
    %cst_67 = arith.constant 0.000000e+00 : f32
    %90 = vector.broadcast %cst_67 : f32 to vector<14x32xf32>
    %c50 = arith.constant 50 : index
    %c0_68 = arith.constant 0 : index
    %91 = vector.load %arg9[%c50, %c0_68] : memref<128x32xf32, #tpu.memory_space<vmem>>, vector<14x32xf32>
    tpu.vector_store %arg9[%c50, %c0_68], %90 {strides = array<i32>} : memref<128x32xf32, #tpu.memory_space<vmem>>, vector<14x32xf32>,
    %cst_69 = arith.constant 0.000000e+00 : f32
    %92 = vector.broadcast %cst_69 : f32 to vector<14x32xf32>
    %c66 = arith.constant 66 : index
    %c0_70 = arith.constant 0 : index
    %93 = vector.load %arg9[%c66, %c0_70] : memref<128x32xf32, #tpu.memory_space<vmem>>, vector<14x32xf32>
    tpu.vector_store %arg9[%c66, %c0_70], %92 {strides = array<i32>} : memref<128x32xf32, #tpu.memory_space<vmem>>, vector<14x32xf32>,
    %cst_71 = arith.constant 0.000000e+00 : f32
    %94 = vector.broadcast %cst_71 : f32 to vector<14x32xf32>
    %c82 = arith.constant 82 : index
    %c0_72 = arith.constant 0 : index
    %95 = vector.load %arg9[%c82, %c0_72] : memref<128x32xf32, #tpu.memory_space<vmem>>, vector<14x32xf32>
    tpu.vector_store %arg9[%c82, %c0_72], %94 {strides = array<i32>} : memref<128x32xf32, #tpu.memory_space<vmem>>, vector<14x32xf32>,
    %cst_73 = arith.constant 0.000000e+00 : f32
    %96 = vector.broadcast %cst_73 : f32 to vector<14x32xf32>
    %c98 = arith.constant 98 : index
    %c0_74 = arith.constant 0 : index
    %97 = vector.load %arg9[%c98, %c0_74] : memref<128x32xf32, #tpu.memory_space<vmem>>, vector<14x32xf32>
    tpu.vector_store %arg9[%c98, %c0_74], %96 {strides = array<i32>} : memref<128x32xf32, #tpu.memory_space<vmem>>, vector<14x32xf32>,
    %cst_75 = arith.constant 0.000000e+00 : f32
    %98 = vector.broadcast %cst_75 : f32 to vector<14x32xf32>
    %c114 = arith.constant 114 : index
    %c0_76 = arith.constant 0 : index
    %99 = vector.load %arg9[%c114, %c0_76] : memref<128x32xf32, #tpu.memory_space<vmem>>, vector<14x32xf32>
    tpu.vector_store %arg9[%c114, %c0_76], %98 {strides = array<i32>} : memref<128x32xf32, #tpu.memory_space<vmem>>, vector<14x32xf32>,
    %c0_i32_77 = arith.constant 0 : i32
    %c0_i32_78 = arith.constant 0 : i32
    %c0_i32_79 = arith.constant 0 : i32
    %100 = tpu.memref_slice %arg2[%4, %c0_i32_79] : memref<64x32xf32, #tpu.memory_space<any>> -> memref<1x32xf32, #tpu.memory_space<any>>
    %c0_i32_80 = arith.constant 0 : i32
    %c0_i32_81 = arith.constant 0 : i32
    %101 = tpu.memref_slice %arg9[%c0_i32_80, %c0_i32_81] : memref<128x32xf32, #tpu.memory_space<vmem>> -> memref<1x32xf32, #tpu.memory_space<vmem>>
    %102 = tpu.memref_slice %arg11[%c0_i32_77, %c0_i32_78] : memref<8x2x!tpu.dma_semaphore, #tpu.memory_space<semaphore_mem>> -> memref<1x1x!tpu.dma_semaphore, #tpu.memory_space<semaphore_mem>>
    %103 = tpu.memref_squeeze %102 : memref<1x1x!tpu.dma_semaphore, #tpu.memory_space<semaphore_mem>> -> memref<!tpu.dma_semaphore, #tpu.memory_space<semaphore_mem>>
    tpu.wait_dma2 semaphore(%103 : memref<!tpu.dma_semaphore, #tpu.memory_space<semaphore_mem>>) src(%100 : memref<1x32xf32, #tpu.memory_space<any>>) dst(%101 : memref<1x32xf32, #tpu.memory_space<vmem>>)
    %c0_i32_82 = arith.constant 0 : i32
    %c1_i32_83 = arith.constant 1 : i32
    %c0_i32_84 = arith.constant 0 : i32
    %104 = tpu.memref_slice %arg2[%9, %c0_i32_84] : memref<64x32xf32, #tpu.memory_space<any>> -> memref<1x32xf32, #tpu.memory_space<any>>
    %c1_i32_85 = arith.constant 1 : i32
    %c0_i32_86 = arith.constant 0 : i32
    %105 = tpu.memref_slice %arg9[%c1_i32_85, %c0_i32_86] : memref<128x32xf32, #tpu.memory_space<vmem>> -> memref<1x32xf32, #tpu.memory_space<vmem>>
    %106 = tpu.memref_slice %arg11[%c0_i32_82, %c1_i32_83] : memref<8x2x!tpu.dma_semaphore, #tpu.memory_space<semaphore_mem>> -> memref<1x1x!tpu.dma_semaphore, #tpu.memory_space<semaphore_mem>>
    %107 = tpu.memref_squeeze %106 : memref<1x1x!tpu.dma_semaphore, #tpu.memory_space<semaphore_mem>> -> memref<!tpu.dma_semaphore, #tpu.memory_space<semaphore_mem>>
    tpu.wait_dma2 semaphore(%107 : memref<!tpu.dma_semaphore, #tpu.memory_space<semaphore_mem>>) src(%104 : memref<1x32xf32, #tpu.memory_space<any>>) dst(%105 : memref<1x32xf32, #tpu.memory_space<vmem>>)
    %c1_i32_87 = arith.constant 1 : i32
    %c0_i32_88 = arith.constant 0 : i32
    %c0_i32_89 = arith.constant 0 : i32
    %108 = tpu.memref_slice %arg2[%14, %c0_i32_89] : memref<64x32xf32, #tpu.memory_space<any>> -> memref<1x32xf32, #tpu.memory_space<any>>
    %c16_i32_90 = arith.constant 16 : i32
    %c0_i32_91 = arith.constant 0 : i32
    %109 = tpu.memref_slice %arg9[%c16_i32_90, %c0_i32_91] : memref<128x32xf32, #tpu.memory_space<vmem>> -> memref<1x32xf32, #tpu.memory_space<vmem>>
    %110 = tpu.memref_slice %arg11[%c1_i32_87, %c0_i32_88] : memref<8x2x!tpu.dma_semaphore, #tpu.memory_space<semaphore_mem>> -> memref<1x1x!tpu.dma_semaphore, #tpu.memory_space<semaphore_mem>>
    %111 = tpu.memref_squeeze %110 : memref<1x1x!tpu.dma_semaphore, #tpu.memory_space<semaphore_mem>> -> memref<!tpu.dma_semaphore, #tpu.memory_space<semaphore_mem>>
    tpu.wait_dma2 semaphore(%111 : memref<!tpu.dma_semaphore, #tpu.memory_space<semaphore_mem>>) src(%108 : memref<1x32xf32, #tpu.memory_space<any>>) dst(%109 : memref<1x32xf32, #tpu.memory_space<vmem>>)
    %c1_i32_92 = arith.constant 1 : i32
    %c1_i32_93 = arith.constant 1 : i32
    %c0_i32_94 = arith.constant 0 : i32
    %112 = tpu.memref_slice %arg2[%19, %c0_i32_94] : memref<64x32xf32, #tpu.memory_space<any>> -> memref<1x32xf32, #tpu.memory_space<any>>
    %c17_i32_95 = arith.constant 17 : i32
    %c0_i32_96 = arith.constant 0 : i32
    %113 = tpu.memref_slice %arg9[%c17_i32_95, %c0_i32_96] : memref<128x32xf32, #tpu.memory_space<vmem>> -> memref<1x32xf32, #tpu.memory_space<vmem>>
    %114 = tpu.memref_slice %arg11[%c1_i32_92, %c1_i32_93] : memref<8x2x!tpu.dma_semaphore, #tpu.memory_space<semaphore_mem>> -> memref<1x1x!tpu.dma_semaphore, #tpu.memory_space<semaphore_mem>>
    %115 = tpu.memref_squeeze %114 : memref<1x1x!tpu.dma_semaphore, #tpu.memory_space<semaphore_mem>> -> memref<!tpu.dma_semaphore, #tpu.memory_space<semaphore_mem>>
    tpu.wait_dma2 semaphore(%115 : memref<!tpu.dma_semaphore, #tpu.memory_space<semaphore_mem>>) src(%112 : memref<1x32xf32, #tpu.memory_space<any>>) dst(%113 : memref<1x32xf32, #tpu.memory_space<vmem>>)
    %c2_i32_97 = arith.constant 2 : i32
    %c0_i32_98 = arith.constant 0 : i32
    %c0_i32_99 = arith.constant 0 : i32
    %116 = tpu.memref_slice %arg2[%24, %c0_i32_99] : memref<64x32xf32, #tpu.memory_space<any>> -> memref<1x32xf32, #tpu.memory_space<any>>
    %c32_i32_100 = arith.constant 32 : i32
    %c0_i32_101 = arith.constant 0 : i32
    %117 = tpu.memref_slice %arg9[%c32_i32_100, %c0_i32_101] : memref<128x32xf32, #tpu.memory_space<vmem>> -> memref<1x32xf32, #tpu.memory_space<vmem>>
    %118 = tpu.memref_slice %arg11[%c2_i32_97, %c0_i32_98] : memref<8x2x!tpu.dma_semaphore, #tpu.memory_space<semaphore_mem>> -> memref<1x1x!tpu.dma_semaphore, #tpu.memory_space<semaphore_mem>>
    %119 = tpu.memref_squeeze %118 : memref<1x1x!tpu.dma_semaphore, #tpu.memory_space<semaphore_mem>> -> memref<!tpu.dma_semaphore, #tpu.memory_space<semaphore_mem>>
    tpu.wait_dma2 semaphore(%119 : memref<!tpu.dma_semaphore, #tpu.memory_space<semaphore_mem>>) src(%116 : memref<1x32xf32, #tpu.memory_space<any>>) dst(%117 : memref<1x32xf32, #tpu.memory_space<vmem>>)
    %c2_i32_102 = arith.constant 2 : i32
    %c1_i32_103 = arith.constant 1 : i32
    %c0_i32_104 = arith.constant 0 : i32
    %120 = tpu.memref_slice %arg2[%29, %c0_i32_104] : memref<64x32xf32, #tpu.memory_space<any>> -> memref<1x32xf32, #tpu.memory_space<any>>
    %c33_i32_105 = arith.constant 33 : i32
    %c0_i32_106 = arith.constant 0 : i32
    %121 = tpu.memref_slice %arg9[%c33_i32_105, %c0_i32_106] : memref<128x32xf32, #tpu.memory_space<vmem>> -> memref<1x32xf32, #tpu.memory_space<vmem>>
    %122 = tpu.memref_slice %arg11[%c2_i32_102, %c1_i32_103] : memref<8x2x!tpu.dma_semaphore, #tpu.memory_space<semaphore_mem>> -> memref<1x1x!tpu.dma_semaphore, #tpu.memory_space<semaphore_mem>>
    %123 = tpu.memref_squeeze %122 : memref<1x1x!tpu.dma_semaphore, #tpu.memory_space<semaphore_mem>> -> memref<!tpu.dma_semaphore, #tpu.memory_space<semaphore_mem>>
    tpu.wait_dma2 semaphore(%123 : memref<!tpu.dma_semaphore, #tpu.memory_space<semaphore_mem>>) src(%120 : memref<1x32xf32, #tpu.memory_space<any>>) dst(%121 : memref<1x32xf32, #tpu.memory_space<vmem>>)
    %c3_i32_107 = arith.constant 3 : i32
    %c0_i32_108 = arith.constant 0 : i32
    %c0_i32_109 = arith.constant 0 : i32
    %124 = tpu.memref_slice %arg2[%34, %c0_i32_109] : memref<64x32xf32, #tpu.memory_space<any>> -> memref<1x32xf32, #tpu.memory_space<any>>
    %c48_i32_110 = arith.constant 48 : i32
    %c0_i32_111 = arith.constant 0 : i32
    %125 = tpu.memref_slice %arg9[%c48_i32_110, %c0_i32_111] : memref<128x32xf32, #tpu.memory_space<vmem>> -> memref<1x32xf32, #tpu.memory_space<vmem>>
    %126 = tpu.memref_slice %arg11[%c3_i32_107, %c0_i32_108] : memref<8x2x!tpu.dma_semaphore, #tpu.memory_space<semaphore_mem>> -> memref<1x1x!tpu.dma_semaphore, #tpu.memory_space<semaphore_mem>>
    %127 = tpu.memref_squeeze %126 : memref<1x1x!tpu.dma_semaphore, #tpu.memory_space<semaphore_mem>> -> memref<!tpu.dma_semaphore, #tpu.memory_space<semaphore_mem>>
    tpu.wait_dma2 semaphore(%127 : memref<!tpu.dma_semaphore, #tpu.memory_space<semaphore_mem>>) src(%124 : memref<1x32xf32, #tpu.memory_space<any>>) dst(%125 : memref<1x32xf32, #tpu.memory_space<vmem>>)
    %c3_i32_112 = arith.constant 3 : i32
    %c1_i32_113 = arith.constant 1 : i32
    %c0_i32_114 = arith.constant 0 : i32
    %128 = tpu.memref_slice %arg2[%39, %c0_i32_114] : memref<64x32xf32, #tpu.memory_space<any>> -> memref<1x32xf32, #tpu.memory_space<any>>
    %c49_i32_115 = arith.constant 49 : i32
    %c0_i32_116 = arith.constant 0 : i32
    %129 = tpu.memref_slice %arg9[%c49_i32_115, %c0_i32_116] : memref<128x32xf32, #tpu.memory_space<vmem>> -> memref<1x32xf32, #tpu.memory_space<vmem>>
    %130 = tpu.memref_slice %arg11[%c3_i32_112, %c1_i32_113] : memref<8x2x!tpu.dma_semaphore, #tpu.memory_space<semaphore_mem>> -> memref<1x1x!tpu.dma_semaphore, #tpu.memory_space<semaphore_mem>>
    %131 = tpu.memref_squeeze %130 : memref<1x1x!tpu.dma_semaphore, #tpu.memory_space<semaphore_mem>> -> memref<!tpu.dma_semaphore, #tpu.memory_space<semaphore_mem>>
    tpu.wait_dma2 semaphore(%131 : memref<!tpu.dma_semaphore, #tpu.memory_space<semaphore_mem>>) src(%128 : memref<1x32xf32, #tpu.memory_space<any>>) dst(%129 : memref<1x32xf32, #tpu.memory_space<vmem>>)
    %c4_i32_117 = arith.constant 4 : i32
    %c0_i32_118 = arith.constant 0 : i32
    %c0_i32_119 = arith.constant 0 : i32
    %132 = tpu.memref_slice %arg2[%44, %c0_i32_119] : memref<64x32xf32, #tpu.memory_space<any>> -> memref<1x32xf32, #tpu.memory_space<any>>
    %c64_i32_120 = arith.constant 64 : i32
    %c0_i32_121 = arith.constant 0 : i32
    %133 = tpu.memref_slice %arg9[%c64_i32_120, %c0_i32_121] : memref<128x32xf32, #tpu.memory_space<vmem>> -> memref<1x32xf32, #tpu.memory_space<vmem>>
    %134 = tpu.memref_slice %arg11[%c4_i32_117, %c0_i32_118] : memref<8x2x!tpu.dma_semaphore, #tpu.memory_space<semaphore_mem>> -> memref<1x1x!tpu.dma_semaphore, #tpu.memory_space<semaphore_mem>>
    %135 = tpu.memref_squeeze %134 : memref<1x1x!tpu.dma_semaphore, #tpu.memory_space<semaphore_mem>> -> memref<!tpu.dma_semaphore, #tpu.memory_space<semaphore_mem>>
    tpu.wait_dma2 semaphore(%135 : memref<!tpu.dma_semaphore, #tpu.memory_space<semaphore_mem>>) src(%132 : memref<1x32xf32, #tpu.memory_space<any>>) dst(%133 : memref<1x32xf32, #tpu.memory_space<vmem>>)
    %c4_i32_122 = arith.constant 4 : i32
    %c1_i32_123 = arith.constant 1 : i32
    %c0_i32_124 = arith.constant 0 : i32
    %136 = tpu.memref_slice %arg2[%49, %c0_i32_124] : memref<64x32xf32, #tpu.memory_space<any>> -> memref<1x32xf32, #tpu.memory_space<any>>
    %c65_i32_125 = arith.constant 65 : i32
    %c0_i32_126 = arith.constant 0 : i32
    %137 = tpu.memref_slice %arg9[%c65_i32_125, %c0_i32_126] : memref<128x32xf32, #tpu.memory_space<vmem>> -> memref<1x32xf32, #tpu.memory_space<vmem>>
    %138 = tpu.memref_slice %arg11[%c4_i32_122, %c1_i32_123] : memref<8x2x!tpu.dma_semaphore, #tpu.memory_space<semaphore_mem>> -> memref<1x1x!tpu.dma_semaphore, #tpu.memory_space<semaphore_mem>>
    %139 = tpu.memref_squeeze %138 : memref<1x1x!tpu.dma_semaphore, #tpu.memory_space<semaphore_mem>> -> memref<!tpu.dma_semaphore, #tpu.memory_space<semaphore_mem>>
    tpu.wait_dma2 semaphore(%139 : memref<!tpu.dma_semaphore, #tpu.memory_space<semaphore_mem>>) src(%136 : memref<1x32xf32, #tpu.memory_space<any>>) dst(%137 : memref<1x32xf32, #tpu.memory_space<vmem>>)
    %c5_i32_127 = arith.constant 5 : i32
    %c0_i32_128 = arith.constant 0 : i32
    %c0_i32_129 = arith.constant 0 : i32
    %140 = tpu.memref_slice %arg2[%54, %c0_i32_129] : memref<64x32xf32, #tpu.memory_space<any>> -> memref<1x32xf32, #tpu.memory_space<any>>
    %c80_i32_130 = arith.constant 80 : i32
    %c0_i32_131 = arith.constant 0 : i32
    %141 = tpu.memref_slice %arg9[%c80_i32_130, %c0_i32_131] : memref<128x32xf32, #tpu.memory_space<vmem>> -> memref<1x32xf32, #tpu.memory_space<vmem>>
    %142 = tpu.memref_slice %arg11[%c5_i32_127, %c0_i32_128] : memref<8x2x!tpu.dma_semaphore, #tpu.memory_space<semaphore_mem>> -> memref<1x1x!tpu.dma_semaphore, #tpu.memory_space<semaphore_mem>>
    %143 = tpu.memref_squeeze %142 : memref<1x1x!tpu.dma_semaphore, #tpu.memory_space<semaphore_mem>> -> memref<!tpu.dma_semaphore, #tpu.memory_space<semaphore_mem>>
    tpu.wait_dma2 semaphore(%143 : memref<!tpu.dma_semaphore, #tpu.memory_space<semaphore_mem>>) src(%140 : memref<1x32xf32, #tpu.memory_space<any>>) dst(%141 : memref<1x32xf32, #tpu.memory_space<vmem>>)
    %c5_i32_132 = arith.constant 5 : i32
    %c1_i32_133 = arith.constant 1 : i32
    %c0_i32_134 = arith.constant 0 : i32
    %144 = tpu.memref_slice %arg2[%59, %c0_i32_134] : memref<64x32xf32, #tpu.memory_space<any>> -> memref<1x32xf32, #tpu.memory_space<any>>
    %c81_i32_135 = arith.constant 81 : i32
    %c0_i32_136 = arith.constant 0 : i32
    %145 = tpu.memref_slice %arg9[%c81_i32_135, %c0_i32_136] : memref<128x32xf32, #tpu.memory_space<vmem>> -> memref<1x32xf32, #tpu.memory_space<vmem>>
    %146 = tpu.memref_slice %arg11[%c5_i32_132, %c1_i32_133] : memref<8x2x!tpu.dma_semaphore, #tpu.memory_space<semaphore_mem>> -> memref<1x1x!tpu.dma_semaphore, #tpu.memory_space<semaphore_mem>>
    %147 = tpu.memref_squeeze %146 : memref<1x1x!tpu.dma_semaphore, #tpu.memory_space<semaphore_mem>> -> memref<!tpu.dma_semaphore, #tpu.memory_space<semaphore_mem>>
    tpu.wait_dma2 semaphore(%147 : memref<!tpu.dma_semaphore, #tpu.memory_space<semaphore_mem>>) src(%144 : memref<1x32xf32, #tpu.memory_space<any>>) dst(%145 : memref<1x32xf32, #tpu.memory_space<vmem>>)
    %c6_i32_137 = arith.constant 6 : i32
    %c0_i32_138 = arith.constant 0 : i32
    %c0_i32_139 = arith.constant 0 : i32
    %148 = tpu.memref_slice %arg2[%64, %c0_i32_139] : memref<64x32xf32, #tpu.memory_space<any>> -> memref<1x32xf32, #tpu.memory_space<any>>
    %c96_i32_140 = arith.constant 96 : i32
    %c0_i32_141 = arith.constant 0 : i32
    %149 = tpu.memref_slice %arg9[%c96_i32_140, %c0_i32_141] : memref<128x32xf32, #tpu.memory_space<vmem>> -> memref<1x32xf32, #tpu.memory_space<vmem>>
    %150 = tpu.memref_slice %arg11[%c6_i32_137, %c0_i32_138] : memref<8x2x!tpu.dma_semaphore, #tpu.memory_space<semaphore_mem>> -> memref<1x1x!tpu.dma_semaphore, #tpu.memory_space<semaphore_mem>>
    %151 = tpu.memref_squeeze %150 : memref<1x1x!tpu.dma_semaphore, #tpu.memory_space<semaphore_mem>> -> memref<!tpu.dma_semaphore, #tpu.memory_space<semaphore_mem>>
    tpu.wait_dma2 semaphore(%151 : memref<!tpu.dma_semaphore, #tpu.memory_space<semaphore_mem>>) src(%148 : memref<1x32xf32, #tpu.memory_space<any>>) dst(%149 : memref<1x32xf32, #tpu.memory_space<vmem>>)
    %c6_i32_142 = arith.constant 6 : i32
    %c1_i32_143 = arith.constant 1 : i32
    %c0_i32_144 = arith.constant 0 : i32
    %152 = tpu.memref_slice %arg2[%69, %c0_i32_144] : memref<64x32xf32, #tpu.memory_space<any>> -> memref<1x32xf32, #tpu.memory_space<any>>
    %c97_i32_145 = arith.constant 97 : i32
    %c0_i32_146 = arith.constant 0 : i32
    %153 = tpu.memref_slice %arg9[%c97_i32_145, %c0_i32_146] : memref<128x32xf32, #tpu.memory_space<vmem>> -> memref<1x32xf32, #tpu.memory_space<vmem>>
    %154 = tpu.memref_slice %arg11[%c6_i32_142, %c1_i32_143] : memref<8x2x!tpu.dma_semaphore, #tpu.memory_space<semaphore_mem>> -> memref<1x1x!tpu.dma_semaphore, #tpu.memory_space<semaphore_mem>>
    %155 = tpu.memref_squeeze %154 : memref<1x1x!tpu.dma_semaphore, #tpu.memory_space<semaphore_mem>> -> memref<!tpu.dma_semaphore, #tpu.memory_space<semaphore_mem>>
    tpu.wait_dma2 semaphore(%155 : memref<!tpu.dma_semaphore, #tpu.memory_space<semaphore_mem>>) src(%152 : memref<1x32xf32, #tpu.memory_space<any>>) dst(%153 : memref<1x32xf32, #tpu.memory_space<vmem>>)
    %c7_i32_147 = arith.constant 7 : i32
    %c0_i32_148 = arith.constant 0 : i32
    %c0_i32_149 = arith.constant 0 : i32
    %156 = tpu.memref_slice %arg2[%74, %c0_i32_149] : memref<64x32xf32, #tpu.memory_space<any>> -> memref<1x32xf32, #tpu.memory_space<any>>
    %c112_i32_150 = arith.constant 112 : i32
    %c0_i32_151 = arith.constant 0 : i32
    %157 = tpu.memref_slice %arg9[%c112_i32_150, %c0_i32_151] : memref<128x32xf32, #tpu.memory_space<vmem>> -> memref<1x32xf32, #tpu.memory_space<vmem>>
    %158 = tpu.memref_slice %arg11[%c7_i32_147, %c0_i32_148] : memref<8x2x!tpu.dma_semaphore, #tpu.memory_space<semaphore_mem>> -> memref<1x1x!tpu.dma_semaphore, #tpu.memory_space<semaphore_mem>>
    %159 = tpu.memref_squeeze %158 : memref<1x1x!tpu.dma_semaphore, #tpu.memory_space<semaphore_mem>> -> memref<!tpu.dma_semaphore, #tpu.memory_space<semaphore_mem>>
    tpu.wait_dma2 semaphore(%159 : memref<!tpu.dma_semaphore, #tpu.memory_space<semaphore_mem>>) src(%156 : memref<1x32xf32, #tpu.memory_space<any>>) dst(%157 : memref<1x32xf32, #tpu.memory_space<vmem>>)
    %c7_i32_152 = arith.constant 7 : i32
    %c1_i32_153 = arith.constant 1 : i32
    %c0_i32_154 = arith.constant 0 : i32
    %160 = tpu.memref_slice %arg2[%79, %c0_i32_154] : memref<64x32xf32, #tpu.memory_space<any>> -> memref<1x32xf32, #tpu.memory_space<any>>
    %c113_i32_155 = arith.constant 113 : i32
    %c0_i32_156 = arith.constant 0 : i32
    %161 = tpu.memref_slice %arg9[%c113_i32_155, %c0_i32_156] : memref<128x32xf32, #tpu.memory_space<vmem>> -> memref<1x32xf32, #tpu.memory_space<vmem>>
    %162 = tpu.memref_slice %arg11[%c7_i32_152, %c1_i32_153] : memref<8x2x!tpu.dma_semaphore, #tpu.memory_space<semaphore_mem>> -> memref<1x1x!tpu.dma_semaphore, #tpu.memory_space<semaphore_mem>>
    %163 = tpu.memref_squeeze %162 : memref<1x1x!tpu.dma_semaphore, #tpu.memory_space<semaphore_mem>> -> memref<!tpu.dma_semaphore, #tpu.memory_space<semaphore_mem>>
    tpu.wait_dma2 semaphore(%163 : memref<!tpu.dma_semaphore, #tpu.memory_space<semaphore_mem>>) src(%160 : memref<1x32xf32, #tpu.memory_space<any>>) dst(%161 : memref<1x32xf32, #tpu.memory_space<vmem>>)
    %c0_157 = arith.constant 0 : index
    %c0_158 = arith.constant 0 : index
    %164 = vector.load %arg9[%c0_157, %c0_158] : memref<128x32xf32, #tpu.memory_space<vmem>>, vector<128x32xf32>
    %165 = arith.truncf %164 : vector<128x32xf32> to vector<128x32xbf16>
    %c0_159 = arith.constant 0 : index
    %c0_160 = arith.constant 0 : index
    %166 = vector.load %arg3[%c0_159, %c0_160] : memref<32x128xbf16, #tpu.memory_space<vmem>>, vector<32x128xbf16>
    %cst_161 = arith.constant dense<0.000000e+00> : vector<128x128xf32>
    %167 = tpu.matmul %165, %166, %cst_161 {dimension_numbers = #tpu.dot_dimension_numbers<[1], [0], [0], [1], [0, 0, 1, 1], [], []>} : vector<128x32xbf16>, vector<32x128xbf16>, vector<128x128xf32> -> vector<128x128xf32>
    %c0_162 = arith.constant 0 : index
    %c0_163 = arith.constant 0 : index
    %168 = vector.load %arg5[%c0_162, %c0_163] : memref<1x128xf32, #tpu.memory_space<vmem>>, vector<1x128xf32>
    %169 = vector.broadcast %168 : vector<1x128xf32> to vector<128x128xf32>
    %170 = arith.addf %167, %169 : vector<128x128xf32>
    %c0_164 = arith.constant 0 : index
    %c0_165 = arith.constant 0 : index
    %171 = vector.load %arg4[%c0_164, %c0_165] : memref<32x128xbf16, #tpu.memory_space<vmem>>, vector<32x128xbf16>
    %cst_166 = arith.constant 0.000000e+00 : f32
    %172 = vector.broadcast %cst_166 : f32 to vector<16x32xf32>
    %cst_167 = arith.constant 0.000000e+00 : f32
    %173 = vector.broadcast %cst_167 : f32 to vector<16x32xf32>
    %174 = vector.extract_strided_slice %170 {offsets = [0, 0], sizes = [16, 128], strides = [1, 1]} : vector<128x128xf32> to vector<16x128xf32>
    %175 = arith.truncf %172 : vector<16x32xf32> to vector<16x32xbf16>
    %cst_168 = arith.constant dense<0.000000e+00> : vector<16x128xf32>
    %176 = tpu.matmul %175, %171, %cst_168 {dimension_numbers = #tpu.dot_dimension_numbers<[1], [0], [0], [1], [0, 0, 1, 1], [], []>} : vector<16x32xbf16>, vector<32x128xbf16>, vector<16x128xf32> -> vector<16x128xf32>
    %177 = arith.addf %174, %176 : vector<16x128xf32>
    %178 = arith.negf %177 : vector<16x128xf32>
    %179 = math.exp %178 : vector<16x128xf32>
    %cst_169 = arith.constant 1.000000e+00 : f32
    %180 = vector.broadcast %cst_169 : f32 to vector<16x128xf32>
    %181 = arith.addf %180, %179 : vector<16x128xf32>
    %182 = arith.divf %180, %181 : vector<16x128xf32>
    %183 = vector.extract_strided_slice %182 {offsets = [0, 0], sizes = [16, 32], strides = [1, 1]} : vector<16x128xf32> to vector<16x32xf32>
    %184 = vector.extract_strided_slice %182 {offsets = [0, 32], sizes = [16, 32], strides = [1, 1]} : vector<16x128xf32> to vector<16x32xf32>
    %185 = vector.extract_strided_slice %182 {offsets = [0, 64], sizes = [16, 32], strides = [1, 1]} : vector<16x128xf32> to vector<16x32xf32>
    %cst_170 = arith.constant 2.000000e+00 : f32
    %186 = vector.broadcast %cst_170 : f32 to vector<16x32xf32>
    %187 = arith.mulf %186, %185 : vector<16x32xf32>
    %cst_171 = arith.constant 1.000000e+00 : f32
    %188 = vector.broadcast %cst_171 : f32 to vector<16x32xf32>
    %189 = arith.subf %187, %188 : vector<16x32xf32>
    %190 = vector.extract_strided_slice %182 {offsets = [0, 96], sizes = [16, 32], strides = [1, 1]} : vector<16x128xf32> to vector<16x32xf32>
    %191 = arith.mulf %184, %173 : vector<16x32xf32>
    %192 = arith.mulf %183, %189 : vector<16x32xf32>
    %193 = arith.addf %191, %192 : vector<16x32xf32>
    %194 = math.tanh %193 : vector<16x32xf32>
    %195 = arith.mulf %190, %194 : vector<16x32xf32>
    %196 = vector.extract_strided_slice %170 {offsets = [16, 0], sizes = [16, 128], strides = [1, 1]} : vector<128x128xf32> to vector<16x128xf32>
    %197 = arith.truncf %195 : vector<16x32xf32> to vector<16x32xbf16>
    %cst_172 = arith.constant dense<0.000000e+00> : vector<16x128xf32>
    %198 = tpu.matmul %197, %171, %cst_172 {dimension_numbers = #tpu.dot_dimension_numbers<[1], [0], [0], [1], [0, 0, 1, 1], [], []>} : vector<16x32xbf16>, vector<32x128xbf16>, vector<16x128xf32> -> vector<16x128xf32>
    %199 = arith.addf %196, %198 : vector<16x128xf32>
    %200 = arith.negf %199 : vector<16x128xf32>
    %201 = math.exp %200 : vector<16x128xf32>
    %cst_173 = arith.constant 1.000000e+00 : f32
    %202 = vector.broadcast %cst_173 : f32 to vector<16x128xf32>
    %203 = arith.addf %202, %201 : vector<16x128xf32>
    %204 = arith.divf %202, %203 : vector<16x128xf32>
    %205 = vector.extract_strided_slice %204 {offsets = [0, 0], sizes = [16, 32], strides = [1, 1]} : vector<16x128xf32> to vector<16x32xf32>
    %206 = vector.extract_strided_slice %204 {offsets = [0, 32], sizes = [16, 32], strides = [1, 1]} : vector<16x128xf32> to vector<16x32xf32>
    %207 = vector.extract_strided_slice %204 {offsets = [0, 64], sizes = [16, 32], strides = [1, 1]} : vector<16x128xf32> to vector<16x32xf32>
    %cst_174 = arith.constant 2.000000e+00 : f32
    %208 = vector.broadcast %cst_174 : f32 to vector<16x32xf32>
    %209 = arith.mulf %208, %207 : vector<16x32xf32>
    %cst_175 = arith.constant 1.000000e+00 : f32
    %210 = vector.broadcast %cst_175 : f32 to vector<16x32xf32>
    %211 = arith.subf %209, %210 : vector<16x32xf32>
    %212 = vector.extract_strided_slice %204 {offsets = [0, 96], sizes = [16, 32], strides = [1, 1]} : vector<16x128xf32> to vector<16x32xf32>
    %213 = arith.mulf %206, %193 : vector<16x32xf32>
    %214 = arith.mulf %205, %211 : vector<16x32xf32>
    %215 = arith.addf %213, %214 : vector<16x32xf32>
    %216 = math.tanh %215 : vector<16x32xf32>
    %217 = arith.mulf %212, %216 : vector<16x32xf32>
    %218 = vector.extract_strided_slice %170 {offsets = [32, 0], sizes = [16, 128], strides = [1, 1]} : vector<128x128xf32> to vector<16x128xf32>
    %219 = arith.truncf %217 : vector<16x32xf32> to vector<16x32xbf16>
    %cst_176 = arith.constant dense<0.000000e+00> : vector<16x128xf32>
    %220 = tpu.matmul %219, %171, %cst_176 {dimension_numbers = #tpu.dot_dimension_numbers<[1], [0], [0], [1], [0, 0, 1, 1], [], []>} : vector<16x32xbf16>, vector<32x128xbf16>, vector<16x128xf32> -> vector<16x128xf32>
    %221 = arith.addf %218, %220 : vector<16x128xf32>
    %222 = arith.negf %221 : vector<16x128xf32>
    %223 = math.exp %222 : vector<16x128xf32>
    %cst_177 = arith.constant 1.000000e+00 : f32
    %224 = vector.broadcast %cst_177 : f32 to vector<16x128xf32>
    %225 = arith.addf %224, %223 : vector<16x128xf32>
    %226 = arith.divf %224, %225 : vector<16x128xf32>
    %227 = vector.extract_strided_slice %226 {offsets = [0, 0], sizes = [16, 32], strides = [1, 1]} : vector<16x128xf32> to vector<16x32xf32>
    %228 = vector.extract_strided_slice %226 {offsets = [0, 32], sizes = [16, 32], strides = [1, 1]} : vector<16x128xf32> to vector<16x32xf32>
    %229 = vector.extract_strided_slice %226 {offsets = [0, 64], sizes = [16, 32], strides = [1, 1]} : vector<16x128xf32> to vector<16x32xf32>
    %cst_178 = arith.constant 2.000000e+00 : f32
    %230 = vector.broadcast %cst_178 : f32 to vector<16x32xf32>
    %231 = arith.mulf %230, %229 : vector<16x32xf32>
    %cst_179 = arith.constant 1.000000e+00 : f32
    %232 = vector.broadcast %cst_179 : f32 to vector<16x32xf32>
    %233 = arith.subf %231, %232 : vector<16x32xf32>
    %234 = vector.extract_strided_slice %226 {offsets = [0, 96], sizes = [16, 32], strides = [1, 1]} : vector<16x128xf32> to vector<16x32xf32>
    %235 = arith.mulf %228, %215 : vector<16x32xf32>
    %236 = arith.mulf %227, %233 : vector<16x32xf32>
    %237 = arith.addf %235, %236 : vector<16x32xf32>
    %238 = math.tanh %237 : vector<16x32xf32>
    %239 = arith.mulf %234, %238 : vector<16x32xf32>
    %240 = vector.extract_strided_slice %170 {offsets = [48, 0], sizes = [16, 128], strides = [1, 1]} : vector<128x128xf32> to vector<16x128xf32>
    %241 = arith.truncf %239 : vector<16x32xf32> to vector<16x32xbf16>
    %cst_180 = arith.constant dense<0.000000e+00> : vector<16x128xf32>
    %242 = tpu.matmul %241, %171, %cst_180 {dimension_numbers = #tpu.dot_dimension_numbers<[1], [0], [0], [1], [0, 0, 1, 1], [], []>} : vector<16x32xbf16>, vector<32x128xbf16>, vector<16x128xf32> -> vector<16x128xf32>
    %243 = arith.addf %240, %242 : vector<16x128xf32>
    %244 = arith.negf %243 : vector<16x128xf32>
    %245 = math.exp %244 : vector<16x128xf32>
    %cst_181 = arith.constant 1.000000e+00 : f32
    %246 = vector.broadcast %cst_181 : f32 to vector<16x128xf32>
    %247 = arith.addf %246, %245 : vector<16x128xf32>
    %248 = arith.divf %246, %247 : vector<16x128xf32>
    %249 = vector.extract_strided_slice %248 {offsets = [0, 0], sizes = [16, 32], strides = [1, 1]} : vector<16x128xf32> to vector<16x32xf32>
    %250 = vector.extract_strided_slice %248 {offsets = [0, 32], sizes = [16, 32], strides = [1, 1]} : vector<16x128xf32> to vector<16x32xf32>
    %251 = vector.extract_strided_slice %248 {offsets = [0, 64], sizes = [16, 32], strides = [1, 1]} : vector<16x128xf32> to vector<16x32xf32>
    %cst_182 = arith.constant 2.000000e+00 : f32
    %252 = vector.broadcast %cst_182 : f32 to vector<16x32xf32>
    %253 = arith.mulf %252, %251 : vector<16x32xf32>
    %cst_183 = arith.constant 1.000000e+00 : f32
    %254 = vector.broadcast %cst_183 : f32 to vector<16x32xf32>
    %255 = arith.subf %253, %254 : vector<16x32xf32>
    %256 = vector.extract_strided_slice %248 {offsets = [0, 96], sizes = [16, 32], strides = [1, 1]} : vector<16x128xf32> to vector<16x32xf32>
    %257 = arith.mulf %250, %237 : vector<16x32xf32>
    %258 = arith.mulf %249, %255 : vector<16x32xf32>
    %259 = arith.addf %257, %258 : vector<16x32xf32>
    %260 = math.tanh %259 : vector<16x32xf32>
    %261 = arith.mulf %256, %260 : vector<16x32xf32>
    %262 = vector.extract_strided_slice %170 {offsets = [64, 0], sizes = [16, 128], strides = [1, 1]} : vector<128x128xf32> to vector<16x128xf32>
    %263 = arith.truncf %261 : vector<16x32xf32> to vector<16x32xbf16>
    %cst_184 = arith.constant dense<0.000000e+00> : vector<16x128xf32>
    %264 = tpu.matmul %263, %171, %cst_184 {dimension_numbers = #tpu.dot_dimension_numbers<[1], [0], [0], [1], [0, 0, 1, 1], [], []>} : vector<16x32xbf16>, vector<32x128xbf16>, vector<16x128xf32> -> vector<16x128xf32>
    %265 = arith.addf %262, %264 : vector<16x128xf32>
    %266 = arith.negf %265 : vector<16x128xf32>
    %267 = math.exp %266 : vector<16x128xf32>
    %cst_185 = arith.constant 1.000000e+00 : f32
    %268 = vector.broadcast %cst_185 : f32 to vector<16x128xf32>
    %269 = arith.addf %268, %267 : vector<16x128xf32>
    %270 = arith.divf %268, %269 : vector<16x128xf32>
    %271 = vector.extract_strided_slice %270 {offsets = [0, 0], sizes = [16, 32], strides = [1, 1]} : vector<16x128xf32> to vector<16x32xf32>
    %272 = vector.extract_strided_slice %270 {offsets = [0, 32], sizes = [16, 32], strides = [1, 1]} : vector<16x128xf32> to vector<16x32xf32>
    %273 = vector.extract_strided_slice %270 {offsets = [0, 64], sizes = [16, 32], strides = [1, 1]} : vector<16x128xf32> to vector<16x32xf32>
    %cst_186 = arith.constant 2.000000e+00 : f32
    %274 = vector.broadcast %cst_186 : f32 to vector<16x32xf32>
    %275 = arith.mulf %274, %273 : vector<16x32xf32>
    %cst_187 = arith.constant 1.000000e+00 : f32
    %276 = vector.broadcast %cst_187 : f32 to vector<16x32xf32>
    %277 = arith.subf %275, %276 : vector<16x32xf32>
    %278 = vector.extract_strided_slice %270 {offsets = [0, 96], sizes = [16, 32], strides = [1, 1]} : vector<16x128xf32> to vector<16x32xf32>
    %279 = arith.mulf %272, %259 : vector<16x32xf32>
    %280 = arith.mulf %271, %277 : vector<16x32xf32>
    %281 = arith.addf %279, %280 : vector<16x32xf32>
    %282 = math.tanh %281 : vector<16x32xf32>
    %283 = arith.mulf %278, %282 : vector<16x32xf32>
    %284 = vector.extract_strided_slice %170 {offsets = [80, 0], sizes = [16, 128], strides = [1, 1]} : vector<128x128xf32> to vector<16x128xf32>
    %285 = arith.truncf %283 : vector<16x32xf32> to vector<16x32xbf16>
    %cst_188 = arith.constant dense<0.000000e+00> : vector<16x128xf32>
    %286 = tpu.matmul %285, %171, %cst_188 {dimension_numbers = #tpu.dot_dimension_numbers<[1], [0], [0], [1], [0, 0, 1, 1], [], []>} : vector<16x32xbf16>, vector<32x128xbf16>, vector<16x128xf32> -> vector<16x128xf32>
    %287 = arith.addf %284, %286 : vector<16x128xf32>
    %288 = arith.negf %287 : vector<16x128xf32>
    %289 = math.exp %288 : vector<16x128xf32>
    %cst_189 = arith.constant 1.000000e+00 : f32
    %290 = vector.broadcast %cst_189 : f32 to vector<16x128xf32>
    %291 = arith.addf %290, %289 : vector<16x128xf32>
    %292 = arith.divf %290, %291 : vector<16x128xf32>
    %293 = vector.extract_strided_slice %292 {offsets = [0, 0], sizes = [16, 32], strides = [1, 1]} : vector<16x128xf32> to vector<16x32xf32>
    %294 = vector.extract_strided_slice %292 {offsets = [0, 32], sizes = [16, 32], strides = [1, 1]} : vector<16x128xf32> to vector<16x32xf32>
    %295 = vector.extract_strided_slice %292 {offsets = [0, 64], sizes = [16, 32], strides = [1, 1]} : vector<16x128xf32> to vector<16x32xf32>
    %cst_190 = arith.constant 2.000000e+00 : f32
    %296 = vector.broadcast %cst_190 : f32 to vector<16x32xf32>
    %297 = arith.mulf %296, %295 : vector<16x32xf32>
    %cst_191 = arith.constant 1.000000e+00 : f32
    %298 = vector.broadcast %cst_191 : f32 to vector<16x32xf32>
    %299 = arith.subf %297, %298 : vector<16x32xf32>
    %300 = vector.extract_strided_slice %292 {offsets = [0, 96], sizes = [16, 32], strides = [1, 1]} : vector<16x128xf32> to vector<16x32xf32>
    %301 = arith.mulf %294, %281 : vector<16x32xf32>
    %302 = arith.mulf %293, %299 : vector<16x32xf32>
    %303 = arith.addf %301, %302 : vector<16x32xf32>
    %304 = math.tanh %303 : vector<16x32xf32>
    %305 = arith.mulf %300, %304 : vector<16x32xf32>
    %306 = vector.extract_strided_slice %170 {offsets = [96, 0], sizes = [16, 128], strides = [1, 1]} : vector<128x128xf32> to vector<16x128xf32>
    %307 = arith.truncf %305 : vector<16x32xf32> to vector<16x32xbf16>
    %cst_192 = arith.constant dense<0.000000e+00> : vector<16x128xf32>
    %308 = tpu.matmul %307, %171, %cst_192 {dimension_numbers = #tpu.dot_dimension_numbers<[1], [0], [0], [1], [0, 0, 1, 1], [], []>} : vector<16x32xbf16>, vector<32x128xbf16>, vector<16x128xf32> -> vector<16x128xf32>
    %309 = arith.addf %306, %308 : vector<16x128xf32>
    %310 = arith.negf %309 : vector<16x128xf32>
    %311 = math.exp %310 : vector<16x128xf32>
    %cst_193 = arith.constant 1.000000e+00 : f32
    %312 = vector.broadcast %cst_193 : f32 to vector<16x128xf32>
    %313 = arith.addf %312, %311 : vector<16x128xf32>
    %314 = arith.divf %312, %313 : vector<16x128xf32>
    %315 = vector.extract_strided_slice %314 {offsets = [0, 0], sizes = [16, 32], strides = [1, 1]} : vector<16x128xf32> to vector<16x32xf32>
    %316 = vector.extract_strided_slice %314 {offsets = [0, 32], sizes = [16, 32], strides = [1, 1]} : vector<16x128xf32> to vector<16x32xf32>
    %317 = vector.extract_strided_slice %314 {offsets = [0, 64], sizes = [16, 32], strides = [1, 1]} : vector<16x128xf32> to vector<16x32xf32>
    %cst_194 = arith.constant 2.000000e+00 : f32
    %318 = vector.broadcast %cst_194 : f32 to vector<16x32xf32>
    %319 = arith.mulf %318, %317 : vector<16x32xf32>
    %cst_195 = arith.constant 1.000000e+00 : f32
    %320 = vector.broadcast %cst_195 : f32 to vector<16x32xf32>
    %321 = arith.subf %319, %320 : vector<16x32xf32>
    %322 = vector.extract_strided_slice %314 {offsets = [0, 96], sizes = [16, 32], strides = [1, 1]} : vector<16x128xf32> to vector<16x32xf32>
    %323 = arith.mulf %316, %303 : vector<16x32xf32>
    %324 = arith.mulf %315, %321 : vector<16x32xf32>
    %325 = arith.addf %323, %324 : vector<16x32xf32>
    %326 = math.tanh %325 : vector<16x32xf32>
    %327 = arith.mulf %322, %326 : vector<16x32xf32>
    %328 = vector.extract_strided_slice %170 {offsets = [112, 0], sizes = [16, 128], strides = [1, 1]} : vector<128x128xf32> to vector<16x128xf32>
    %329 = arith.truncf %327 : vector<16x32xf32> to vector<16x32xbf16>
    %cst_196 = arith.constant dense<0.000000e+00> : vector<16x128xf32>
    %330 = tpu.matmul %329, %171, %cst_196 {dimension_numbers = #tpu.dot_dimension_numbers<[1], [0], [0], [1], [0, 0, 1, 1], [], []>} : vector<16x32xbf16>, vector<32x128xbf16>, vector<16x128xf32> -> vector<16x128xf32>
    %331 = arith.addf %328, %330 : vector<16x128xf32>
    %332 = arith.negf %331 : vector<16x128xf32>
    %333 = math.exp %332 : vector<16x128xf32>
    %cst_197 = arith.constant 1.000000e+00 : f32
    %334 = vector.broadcast %cst_197 : f32 to vector<16x128xf32>
    %335 = arith.addf %334, %333 : vector<16x128xf32>
    %336 = arith.divf %334, %335 : vector<16x128xf32>
    %337 = vector.extract_strided_slice %336 {offsets = [0, 0], sizes = [16, 32], strides = [1, 1]} : vector<16x128xf32> to vector<16x32xf32>
    %338 = vector.extract_strided_slice %336 {offsets = [0, 32], sizes = [16, 32], strides = [1, 1]} : vector<16x128xf32> to vector<16x32xf32>
    %339 = vector.extract_strided_slice %336 {offsets = [0, 64], sizes = [16, 32], strides = [1, 1]} : vector<16x128xf32> to vector<16x32xf32>
    %cst_198 = arith.constant 2.000000e+00 : f32
    %340 = vector.broadcast %cst_198 : f32 to vector<16x32xf32>
    %341 = arith.mulf %340, %339 : vector<16x32xf32>
    %cst_199 = arith.constant 1.000000e+00 : f32
    %342 = vector.broadcast %cst_199 : f32 to vector<16x32xf32>
    %343 = arith.subf %341, %342 : vector<16x32xf32>
    %344 = vector.extract_strided_slice %336 {offsets = [0, 96], sizes = [16, 32], strides = [1, 1]} : vector<16x128xf32> to vector<16x32xf32>
    %345 = arith.mulf %338, %325 : vector<16x32xf32>
    %346 = arith.mulf %337, %343 : vector<16x32xf32>
    %347 = arith.addf %345, %346 : vector<16x32xf32>
    %348 = math.tanh %347 : vector<16x32xf32>
    %349 = arith.mulf %344, %348 : vector<16x32xf32>
    %c0_i32_200 = arith.constant 0 : i32
    %c0_i32_201 = arith.constant 0 : i32
    %c0_i32_202 = arith.constant 0 : i32
    %350 = tpu.memref_slice %arg6[%arg0, %c0_i32_201, %c0_i32_202] : memref<1x32x128xbf16, #tpu.memory_space<any>> -> memref<1x32x128xbf16, #tpu.memory_space<any>>
    %351 = tpu.memref_squeeze %350 : memref<1x32x128xbf16, #tpu.memory_space<any>> -> memref<32x128xbf16, #tpu.memory_space<any>>
    %352 = tpu.memref_slice %arg12[%c0_i32_200] : memref<1x!tpu.dma_semaphore, #tpu.memory_space<semaphore_mem>> -> memref<1x!tpu.dma_semaphore, #tpu.memory_space<semaphore_mem>>
    %353 = tpu.memref_squeeze %352 : memref<1x!tpu.dma_semaphore, #tpu.memory_space<semaphore_mem>> -> memref<!tpu.dma_semaphore, #tpu.memory_space<semaphore_mem>>
    tpu.wait_dma2 semaphore(%353 : memref<!tpu.dma_semaphore, #tpu.memory_space<semaphore_mem>>) src(%351 : memref<32x128xbf16, #tpu.memory_space<any>>) dst(%arg10 : memref<32x128xbf16, #tpu.memory_space<vmem>>)
    %354 = arith.truncf %349 : vector<16x32xf32> to vector<16x32xbf16>
    %c0_203 = arith.constant 0 : index
    %c0_204 = arith.constant 0 : index
    %355 = vector.load %arg10[%c0_203, %c0_204] : memref<32x128xbf16, #tpu.memory_space<vmem>>, vector<32x128xbf16>
    %cst_205 = arith.constant dense<0.000000e+00> : vector<16x128xf32>
    %356 = tpu.matmul %354, %355, %cst_205 {dimension_numbers = #tpu.dot_dimension_numbers<[1], [0], [0], [1], [0, 0, 1, 1], [], []>} : vector<16x32xbf16>, vector<32x128xbf16>, vector<16x128xf32> -> vector<16x128xf32>
    %c0_206 = arith.constant 0 : index
    %c0_207 = arith.constant 0 : index
    %357 = vector.load %arg7[%c0_206, %c0_207] : memref<1x128xf32, #tpu.memory_space<vmem>>, vector<1x128xf32>
    %358 = vector.broadcast %357 : vector<1x128xf32> to vector<16x128xf32>
    %359 = arith.addf %356, %358 : vector<16x128xf32>
    %c0_208 = arith.constant 0 : index
    %c0_209 = arith.constant 0 : index
    %360 = vector.load %arg8[%c0_208, %c0_209] : memref<16x128xf32, #tpu.memory_space<vmem>>, vector<16x128xf32>
    tpu.vector_store %arg8[%c0_208, %c0_209], %359 {strides = array<i32>} : memref<16x128xf32, #tpu.memory_space<vmem>>, vector<16x128xf32>,
    return
  }
  func.func @transform_1(%arg0: i32, %arg1: memref<16xi32, #tpu.memory_space<smem>>) -> (i32, i32) {
    %c0_i32 = arith.constant 0 : i32
    %c0_i32_0 = arith.constant 0 : i32
    %c0_i32_1 = arith.constant 0 : i32
    return %c0_i32, %c0_i32_0 : i32, i32
  }
  func.func @transform_2(%arg0: i32, %arg1: memref<16xi32, #tpu.memory_space<smem>>) -> (i32, i32) {
    %c0_i32 = arith.constant 0 : i32
    %c0_i32_0 = arith.constant 0 : i32
    %c0_i32_1 = arith.constant 0 : i32
    return %c0_i32, %c0_i32_0 : i32, i32
  }
  func.func @transform_3(%arg0: i32, %arg1: memref<16xi32, #tpu.memory_space<smem>>) -> (i32, i32) {
    %c0_i32 = arith.constant 0 : i32
    %c0_i32_0 = arith.constant 0 : i32
    %c0_i32_1 = arith.constant 0 : i32
    return %c0_i32, %c0_i32_0 : i32, i32
  }
  func.func @transform_5(%arg0: i32, %arg1: memref<16xi32, #tpu.memory_space<smem>>) -> (i32, i32) {
    %c0_i32 = arith.constant 0 : i32
    %c0_i32_0 = arith.constant 0 : i32
    return %c0_i32, %arg0 : i32, i32
  }
  func.func @transform_6(%arg0: i32, %arg1: memref<16xi32, #tpu.memory_space<smem>>) -> (i32, i32) {
    %c0_i32 = arith.constant 0 : i32
    %c0_i32_0 = arith.constant 0 : i32
    return %c0_i32, %arg0 : i32, i32
  }
}

</mosaic_0001>

<bundles_post_ra>
// kernel: tpu_custom_call.1
= control target key start
LH: loop header
LB: loop body
LE: loop exit
PB: predicated region body
PF: predicated region fallthrough
CT: control target
= control target key end

     0   :  { %s3026_s0 = inlined_call_operand.vmem [shape: s32[16], index: 0, kind: input, shape index: {}]   ;;  %s3027_s1 = inlined_call_operand.vmem [shape: f32[64,32], index: 1, kind: input, shape index: {}]   ;;  %s3028_s2 = inlined_call_operand.vmem [shape: bf16[32,128], index: 2, kind: input, shape index: {}]   ;;  %s3029_s3 = inlined_call_operand.vmem [shape: bf16[32,128], index: 3, kind: input, shape index: {}]   ;;  %s3030_s4 = inlined_call_operand.vmem [shape: f32[1,128], index: 4, kind: input, shape index: {}]   ;;  %s3031_s5 = inlined_call_operand.vmem [shape: bf16[1,32,128], index: 5, kind: input, shape index: {}]   ;;  %s3032_s6 = inlined_call_operand.vmem [shape: f32[1,128], index: 6, kind: input, shape index: {}]   ;;  %s3033_s7 = inlined_call_operand.hbm [shape: f32[16,128], index: 7, kind: output, shape index: {}]  }
   0x1   :  { %s12_s26 = sshll.u32 %s3026_s0, 4  ;;  %s13_s26 = int_to_ptr.vmem [resolvable:$true] %s12_s26 }
   0x2   :  { %s2591_s27 = scalar_lea.vmem %s13_s26, 16  ;;  %p2596_p1 = scmp.lt.s32.totalorder %s13_s26, %s13_s26 }
   0x3   :  { %p2592_p0 = scmp.ne.s32.totalorder %s13_s26, %s2591_s27  ;;  %p2597_p2 = scmp.lt.s32.totalorder %s2591_s27, %s2591_s27 }
   0x5   :  { %p2598_p3 = por %p2597_p2, %p2596_p1 }
   0x7   :  { %p2599_p4 = pnand %p2598_p3, %p2592_p0 }
   0x9   :  { %2602 = shalt.err (!%p2599_p4)  }
   0xa   :  { %s2663_s28 = smov [#allocation7]  }
   0xb   :  { %15 = dma.vmem_to_smem %s13_s26, 16, %s2663_s28, [#allocation6] }
   0xc   :  { %2625 = dma.done.wait [#allocation6], 16 }
   0xd   :  { %2626 = vsyncadd [#allocation6], 4294967280 }
   0xe   :  { %17 = sfence }
   0xf   :  { %18 = vsyncpa [#allocation9], 0  ;;  %v2718_v0 = vld [vmem:[%s3031_s5] sm:$0xff]  ;;  %v2723_v1 = vld [vmem:[%s3031_s5 + $0x8] sm:$0xff] }
  0x10   :  { %74 = vsyncadd [#allocation5], 256  ;;  %s75_s9 = sld [smem:[#allocation7]] }
  0x16   :  { %s76_s12 = scalar_lea.vmem %s3027_s1, %s75_s9 }
  0x17   :  { %v94_v2 = vld [vmem:[%s76_s12] sm:$0x1] }
  0x18   :  { %95 = vst [vmem:[#allocation2] sm:$0x1] %v94_v2 }
  0x19   :  { %120 = vsyncadd [#allocation4], 16  ;;  %s2267_s13 = sld [smem:[#allocation7 + $0x8]] }
  0x1f   :  { %s122_s16 = scalar_lea.vmem %s3027_s1, %s2267_s13 }
  0x20   :  { %v142_v3 = vld [vmem:[%s122_s16] sm:$0x1] }
  0x21   :  { %143 = vst [vmem:[#allocation2 + $0x1] sm:$0x1] %v142_v3 }
  0x22   :  { %168 = vsyncadd [#allocation4 + $0x1], 16  ;;  %s2268_s17 = sld [smem:[#allocation7 + $0x1]] }
  0x28   :  { %s170_s19 = scalar_lea.vmem %s3027_s1, %s2268_s17 }
  0x29   :  { %v190_v4 = vld [vmem:[%s170_s19] sm:$0x1] }
  0x2a   :  { %191 = vst [vmem:[#allocation2 + $0x10] sm:$0x1] %v190_v4 }
  0x2b   :  { %216 = vsyncadd [#allocation4 + $0x2], 16  ;;  %s2269_s20 = sld [smem:[#allocation7 + $0x9]] }
  0x31   :  { %s218_s23 = scalar_lea.vmem %s3027_s1, %s2269_s20 }
  0x32   :  { %v238_v5 = vld [vmem:[%s218_s23] sm:$0x1] }
  0x33   :  { %239 = vst [vmem:[#allocation2 + $0x11] sm:$0x1] %v238_v5 }
  0x34   :  { %264 = vsyncadd [#allocation4 + $0x3], 16  ;;  %s2270_s24 = sld [smem:[#allocation7 + $0x2]] }
  0x3a   :  { %s266_s27 = scalar_lea.vmem %s3027_s1, %s2270_s24 }
  0x3b   :  { %v286_v6 = vld [vmem:[%s266_s27] sm:$0x1] }
  0x3c   :  { %287 = vst [vmem:[#allocation2 + $0x20] sm:$0x1] %v286_v6 }
  0x3d   :  { %312 = vsyncadd [#allocation4 + $0x4], 16  ;;  %s2271_s28 = sld [smem:[#allocation7 + $0xa]] }
  0x43   :  { %s314_s0 = scalar_lea.vmem %s3027_s1, %s2271_s28 }
  0x44   :  { %v334_v7 = vld [vmem:[%s314_s0] sm:$0x1] }
  0x45   :  { %335 = vst [vmem:[#allocation2 + $0x21] sm:$0x1] %v334_v7 }
  0x46   :  { %360 = vsyncadd [#allocation4 + $0x5], 16  ;;  %s2272_s8 = sld [smem:[#allocation7 + $0x3]] }
  0x4c   :  { %s362_s11 = scalar_lea.vmem %s3027_s1, %s2272_s8 }
  0x4d   :  { %v382_v8 = vld [vmem:[%s362_s11] sm:$0x1] }
  0x4e   :  { %383 = vst [vmem:[#allocation2 + $0x30] sm:$0x1] %v382_v8 }
  0x4f   :  { %408 = vsyncadd [#allocation4 + $0x6], 16  ;;  %s2273_s12 = sld [smem:[#allocation7 + $0xb]] }
  0x55   :  { %s410_s15 = scalar_lea.vmem %s3027_s1, %s2273_s12 }
  0x56   :  { %v430_v9 = vld [vmem:[%s410_s15] sm:$0x1] }
  0x57   :  { %431 = vst [vmem:[#allocation2 + $0x31] sm:$0x1] %v430_v9 }
  0x58   :  { %456 = vsyncadd [#allocation4 + $0x7], 16  ;;  %s2274_s16 = sld [smem:[#allocation7 + $0x4]] }
  0x5e   :  { %s458_s18 = scalar_lea.vmem %s3027_s1, %s2274_s16 }
  0x5f   :  { %v478_v10 = vld [vmem:[%s458_s18] sm:$0x1] }
  0x60   :  { %479 = vst [vmem:[#allocation2 + $0x40] sm:$0x1] %v478_v10 }
  0x61   :  { %504 = vsyncadd [#allocation4 + $0x8], 16  ;;  %s2275_s19 = sld [smem:[#allocation7 + $0xc]] }
  0x67   :  { %s506_s22 = scalar_lea.vmem %s3027_s1, %s2275_s19 }
  0x68   :  { %v526_v11 = vld [vmem:[%s506_s22] sm:$0x1] }
  0x69   :  { %527 = vst [vmem:[#allocation2 + $0x41] sm:$0x1] %v526_v11 }
  0x6a   :  { %552 = vsyncadd [#allocation4 + $0x9], 16  ;;  %s2276_s23 = sld [smem:[#allocation7 + $0x5]] }
  0x70   :  { %s554_s26 = scalar_lea.vmem %s3027_s1, %s2276_s23 }
  0x71   :  { %v574_v12 = vld [vmem:[%s554_s26] sm:$0x1] }
  0x72   :  { %575 = vst [vmem:[#allocation2 + $0x50] sm:$0x1] %v574_v12 }
  0x73   :  { %600 = vsyncadd [#allocation4 + $0xa], 16  ;;  %s2277_s27 = sld [smem:[#allocation7 + $0xd]] }
  0x79   :  { %s602_s30 = scalar_lea.vmem %s3027_s1, %s2277_s27 }
  0x7a   :  { %v622_v13 = vld [vmem:[%s602_s30] sm:$0x1] }
  0x7b   :  { %623 = vst [vmem:[#allocation2 + $0x51] sm:$0x1] %v622_v13 }
  0x7c   :  { %648 = vsyncadd [#allocation4 + $0xb], 16  ;;  %s2278_s0 = sld [smem:[#allocation7 + $0x6]] }
  0x82   :  { %s650_s10 = scalar_lea.vmem %s3027_s1, %s2278_s0 }
  0x83   :  { %v670_v14 = vld [vmem:[%s650_s10] sm:$0x1] }
  0x84   :  { %671 = vst [vmem:[#allocation2 + $0x60] sm:$0x1] %v670_v14 }
  0x85   :  { %696 = vsyncadd [#allocation4 + $0xc], 16  ;;  %s2279_s11 = sld [smem:[#allocation7 + $0xe]] }
  0x8b   :  { %s698_s14 = scalar_lea.vmem %s3027_s1, %s2279_s11 }
  0x8c   :  { %v718_v15 = vld [vmem:[%s698_s14] sm:$0x1] }
  0x8d   :  { %719 = vst [vmem:[#allocation2 + $0x61] sm:$0x1] %v718_v15 }
  0x8e   :  { %744 = vsyncadd [#allocation4 + $0xd], 16  ;;  %s2280_s15 = sld [smem:[#allocation7 + $0x7]] }
  0x94   :  { %s746_s5 = scalar_lea.vmem %s3027_s1, %s2280_s15 }
  0x95   :  { %v766_v16 = vld [vmem:[%s746_s5] sm:$0x1] }
  0x96   :  { %767 = vst [vmem:[#allocation2 + $0x70] sm:$0x1] %v766_v16 }
  0x97   :  { %792 = vsyncadd [#allocation4 + $0xe], 16  ;;  %s2281_s18 = sld [smem:[#allocation7 + $0xf]] }
  0x9d   :  { %s794_s21 = scalar_lea.vmem %s3027_s1, %s2281_s18 }
  0x9e   :  { %v814_v17 = vld [vmem:[%s794_s21] sm:$0x1] }
  0x9f   :  { %815 = vst [vmem:[#allocation2 + $0x71] sm:$0x1] %v814_v17 }
  0xa0   :  { %840 = vsyncadd [#allocation4 + $0xf], 16  ;;  %vm841_vm0 = vcmask 261120   ;;  %vm843_vm1 = vcmask 259072   ;;  %v2664_v18 = vmov 0.0  }
  0xa1   :  { %842 = vst.msk [vmem:[#allocation2 + $0x2] sm:$0xff] %vm841_vm0, %v2664_v18  ;;  %845 = vst.msk [vmem:[#allocation2 + $0x12] sm:$0xff] %vm841_vm0, %v2664_v18 }
  0xa2   :  { %847 = vst.msk [vmem:[#allocation2 + $0x22] sm:$0xff] %vm841_vm0, %v2664_v18  ;;  %849 = vst.msk [vmem:[#allocation2 + $0x32] sm:$0xff] %vm841_vm0, %v2664_v18 }
  0xa3   :  { %851 = vst.msk [vmem:[#allocation2 + $0x42] sm:$0xff] %vm841_vm0, %v2664_v18  ;;  %853 = vst.msk [vmem:[#allocation2 + $0x52] sm:$0xff] %vm841_vm0, %v2664_v18 }
  0xa4   :  { %855 = vst.msk [vmem:[#allocation2 + $0x62] sm:$0xff] %vm841_vm0, %v2664_v18  ;;  %857 = vst.msk [vmem:[#allocation2 + $0x72] sm:$0xff] %vm841_vm0, %v2664_v18 }
  0xa5   :  { %844 = vst.msk [vmem:[#allocation2 + $0xa] sm:$0x3f] %vm843_vm1, %v2664_v18  ;;  %846 = vst.msk [vmem:[#allocation2 + $0x1a] sm:$0x3f] %vm843_vm1, %v2664_v18 }
  0xa6   :  { %848 = vst.msk [vmem:[#allocation2 + $0x2a] sm:$0x3f] %vm843_vm1, %v2664_v18  ;;  %850 = vst.msk [vmem:[#allocation2 + $0x3a] sm:$0x3f] %vm843_vm1, %v2664_v18 }
  0xa7   :  { %852 = vst.msk [vmem:[#allocation2 + $0x4a] sm:$0x3f] %vm843_vm1, %v2664_v18  ;;  %854 = vst.msk [vmem:[#allocation2 + $0x5a] sm:$0x3f] %vm843_vm1, %v2664_v18 }
  0xa8   :  { %856 = vst.msk [vmem:[#allocation2 + $0x6a] sm:$0x3f] %vm843_vm1, %v2664_v18  ;;  %858 = vst.msk [vmem:[#allocation2 + $0x7a] sm:$0x3f] %vm843_vm1, %v2664_v18 }
  0xa9   :  { %2627 = dma.done.wait [#allocation4], 16 }
  0xaa   :  { %2628 = vsyncadd [#allocation4], 4294967280 }
  0xab   :  { %2629 = dma.done.wait [#allocation4 + $0x1], 16 }
  0xac   :  { %2630 = vsyncadd [#allocation4 + $0x1], 4294967280 }
  0xad   :  { %2631 = dma.done.wait [#allocation4 + $0x2], 16 }
  0xae   :  { %2632 = vsyncadd [#allocation4 + $0x2], 4294967280 }
  0xaf   :  { %2633 = dma.done.wait [#allocation4 + $0x3], 16 }
  0xb0   :  { %2634 = vsyncadd [#allocation4 + $0x3], 4294967280 }
  0xb1   :  { %2635 = dma.done.wait [#allocation4 + $0x4], 16 }
  0xb2   :  { %2636 = vsyncadd [#allocation4 + $0x4], 4294967280 }
  0xb3   :  { %2637 = dma.done.wait [#allocation4 + $0x5], 16 }
  0xb4   :  { %2638 = vsyncadd [#allocation4 + $0x5], 4294967280 }
  0xb5   :  { %2639 = dma.done.wait [#allocation4 + $0x6], 16 }
  0xb6   :  { %2640 = vsyncadd [#allocation4 + $0x6], 4294967280 }
  0xb7   :  { %2641 = dma.done.wait [#allocation4 + $0x7], 16 }
  0xb8   :  { %2642 = vsyncadd [#allocation4 + $0x7], 4294967280 }
  0xb9   :  { %2643 = dma.done.wait [#allocation4 + $0x8], 16 }
  0xba   :  { %2644 = vsyncadd [#allocation4 + $0x8], 4294967280 }
  0xbb   :  { %2645 = dma.done.wait [#allocation4 + $0x9], 16 }
  0xbc   :  { %2646 = vsyncadd [#allocation4 + $0x9], 4294967280 }
  0xbd   :  { %2647 = dma.done.wait [#allocation4 + $0xa], 16 }
  0xbe   :  { %2648 = vsyncadd [#allocation4 + $0xa], 4294967280 }
  0xbf   :  { %2649 = dma.done.wait [#allocation4 + $0xb], 16 }
  0xc0   :  { %2650 = vsyncadd [#allocation4 + $0xb], 4294967280 }
  0xc1   :  { %2651 = dma.done.wait [#allocation4 + $0xc], 16 }
  0xc2   :  { %2652 = vsyncadd [#allocation4 + $0xc], 4294967280 }
  0xc3   :  { %2653 = dma.done.wait [#allocation4 + $0xd], 16 }
  0xc4   :  { %2654 = vsyncadd [#allocation4 + $0xd], 4294967280 }
  0xc5   :  { %2655 = dma.done.wait [#allocation4 + $0xe], 16 }
  0xc6   :  { %2656 = vsyncadd [#allocation4 + $0xe], 4294967280 }
  0xc7   :  { %2657 = dma.done.wait [#allocation4 + $0xf], 16 }
  0xc8   :  { %2658 = vsyncadd [#allocation4 + $0xf], 4294967280  ;;  %2410 = vmatprep.subr.bf16.mxu1 %v2664_v18  ;;  %vm2665_vm2 = vmmov 0   ;;  %v2491_v19 = vld [vmem:[%s3028_s2] sm:$0xff]   ;;  %v2493_v21 = vld [vmem:[%s3028_s2 + $0x8] sm:$0xff]   ;;  %v2666_v29 = vmov 0  }
  0xc9   :  { %2414 = vmatprep.mubr.msk.bf16.mxu1 %vm2665_vm2, %v2664_v18  ;;  %v2814_v20 = vld [vmem:[%s3029_s3] sm:$0xff]   ;;  %2390 = vmatprep.subr.bf16.mxu0 %v2491_v19  ;;  %v2823_v22 = vld [vmem:[%s3029_s3 + $0x8] sm:$0xff]   ;;  %v894_v25 = vld [vmem:[#allocation2 + $0x10] sm:$0xff]  ;;  %s2668_s29 = smov 32  }
  0xca   :  { %2391 = vmatpush3.bf16.msra.mxu0 %v2491_v19  ;;  %2411 = vmatpush3.bf16.msra.mxu1 %v2814_v20  ;;  %v892_v23 = vld [vmem:[#allocation2] sm:$0xff]  ;;  %v893_v24 = vld [vmem:[#allocation2 + $0x8] sm:$0xff]  ;;  %v895_v27 = vld [vmem:[#allocation2 + $0x18] sm:$0xff] }
  0xcb   :  { %2392 = vmatprep.subr.bf16.mxu0 %v2493_v21  ;;  %2412 = vmatprep.subr.bf16.mxu1 %v2664_v18  ;;  %v908_v26 = vpack.c.bf16 %v893_v24, %v892_v23  ;;  %v909_v28 = vpack.c.bf16 %v895_v27, %v894_v25  ;;  %v2844_v30 = vld [vmem:[%s3030_s4] ss:$0 sm:$0xff]  ;;  %s2667_s4 = smov 64  }
  0xcd   :  { %2394 = vmatprep.mubr.msk.bf16.mxu0 %vm841_vm0, %v908_v26 }
  0xce   :  { %2393 = vmatpush3.bf16.msra.mxu0 %v2493_v21  ;;  %2413 = vmatpush3.bf16.msra.mxu1 %v2823_v22 }
  0xcf   :  { %2418 = vmatprep.subr.bf16.mxu1 %v2664_v18  ;;  %2442 = vmatprep.subr.bf16.mxu0 %v2664_v18 }
  0xd1   :  { %2395 = vmatmul.mubr.msk.bf16.vlgmr.msra.gmra.mrb[0].mxu0 %vm841_vm0, %v909_v28  ;;  %2415 = vmatmul.mubr.bf16.vlgmr.msra.gmra.mrb[0].mxu1 %v2666_v29 }
  0xd2   :  { %2419 = vmatpush3.bf16.msra.mxu1 %v2814_v20  ;;  %2422 = vmatprep.mubr.msk.bf16.mxu1 %vm2665_vm2, %v2664_v18 }
  0xd3   :  { %2420 = vmatprep.subr.bf16.mxu1 %v2664_v18  ;;  %2443 = vmatpush3.bf16.msra.mxu0 %v2814_v20 }
  0xd4   :  { %2444 = vmatprep.subr.bf16.mxu0 %v2664_v18 }
  0xd6   :  { %2421 = vmatpush3.bf16.msra.mxu1 %v2823_v22 }
  0xd7   :  { %2426 = vmatprep.subr.bf16.mxu1 %v2664_v18  ;;  %2445 = vmatpush3.bf16.msra.mxu0 %v2823_v22 }
  0xd8   :  { %2458 = vmatprep.subr.bf16.mxu0 %v2664_v18 }
 0x1a4   :  { %v2846_v31 = vpop.f32.mrb[0].mxu0  ;;  %v1113_v32 = vpop.f32.mrb[0].mxu1 }
 0x1a5   :  { %v997_v33 = vpop.f32.mrb[1].mxu0  ;;  %v2416_v34 = vpop.f32.mrb[1].mxu1  ;;  %v1006_v11 = vadd.f32 %v2846_v31, %v2844_v30 }
 0x1a6   :  { %v998_v35 = vadd.f32 %v2844_v30, %v997_v33  ;;  %v2397_v36 = vpop.f32.mrb[2].mxu0  ;;  %v1116_v37 = vpop.f32.mrb[2].mxu1 }
 0x1a7   :  { %v1000_v38 = vpop.f32.mrb[3].mxu0  ;;  %v2417_v39 = vpop.f32.mrb[3].mxu1  ;;  %v1009_v13 = vadd.f32 %v2397_v36, %v2844_v30 }
 0x1a8   :  { %v1120_v40 = vadd.f32 %v1113_v32, %v998_v35  ;;  %v1001_v41 = vadd.f32 %v2844_v30, %v1000_v38 }
 0x1aa   :  { %v2295_v42 = vmul.f32 -1.442695, %v1120_v40  ;;  %v1121_v43 = vadd.f32 %v1116_v37, %v1001_v41 }
 0x1ac   :  { %2495 = vpow2.f32 %v2295_v42  ;;  %v2296_v44 = vmul.f32 -1.442695, %v1121_v43 }
 0x1ae   :  { %2497 = vpow2.f32 %v2296_v44 }
 0x1b6   :  { %v2496_v45 = vpop.eup %2495 }
 0x1b7   :  { %v1128_v46 = vadd.f32 1.0, %v2496_v45  ;;  %v896_v45 = vld [vmem:[#allocation2 + $0x20] sm:$0xff] }
 0x1b8   :  { %v2498_v47 = vpop.eup %2497 }
 0x1b9   :  { %2499 = vrcp.f32 %v1128_v46  ;;  %v1129_v48 = vadd.f32 1.0, %v2498_v47  ;;  %v897_v46 = vld [vmem:[#allocation2 + $0x28] sm:$0xff]  ;;  %v898_v47 = vld [vmem:[#allocation2 + $0x30] sm:$0xff] }
 0x1bb   :  { %2501 = vrcp.f32 %v1129_v48  ;;  %v910_v48 = vpack.c.bf16 %v897_v46, %v896_v45 }
 0x1bd   :  { %2398 = vmatprep.mubr.msk.bf16.mxu0 %vm841_vm0, %v910_v48 }
 0x1c3   :  { %v2500_v49 = vpop.eup %2499 }
 0x1c4   :  { %v1134_v50 = vmul.f32 2.0, %v2500_v49  ;;  %v1138_v59 = vmul.f32 0.0, %v2500_v49 }
 0x1c5   :  { %v2502_v51 = vpop.eup %2501 }
 0x1c6   :  { %v2297_v52 = vadd.f32 -1.0, %v1134_v50  ;;  %v1135_v53 = vmul.f32 2.0, %v2502_v51  ;;  %v1139_v62 = vmul.f32 0.0, %v2502_v51 }
 0x1c8   :  { %1142 = vrot.lane.b32.xlu0 %v2297_v52, %s2667_s4  ;;  %v2298_v54 = vadd.f32 -1.0, %v1135_v53 }
 0x1cc   :  { %1144 = vrot.lane.b32.xlu0 %v2298_v54, %s2667_s4 }
 0x23a   :  { %v1143_v55 = vpop.permute.xlu0 %1142 }
 0x23b   :  { %v1148_v56 = vmul.f32 %v2500_v49, %v1143_v55 }
 0x23d   :  { %1152 = vrot.lane.b32.xlu1 %v1148_v56, %s2668_s29 }
 0x23e   :  { %v1145_v57 = vpop.permute.xlu0 %1144 }
 0x23f   :  { %v1149_v58 = vmul.f32 %v2502_v51, %v1145_v57 }
 0x241   :  { %1154 = vrot.lane.b32.xlu1 %v1149_v58, %s2668_s29 }
 0x2af   :  { %v1153_v60 = vpop.permute.xlu1 %1152 }
 0x2b0   :  { %v1158_v61 = vadd.f32 %v1153_v60, %v1138_v59 }
 0x2b2   :  { %2503 = vtanh.f32 %v1158_v61 }
 0x2b3   :  { %v1155_v63 = vpop.permute.xlu1 %1154 }
 0x2b4   :  { %v1159_v2 = vadd.f32 %v1155_v63, %v1139_v62 }
 0x2b6   :  { %2505 = vtanh.f32 %v1159_v2 }
 0x2bc   :  { %v2504_v3 = vpop.eup %2503 }
 0x2bd   :  { %1164 = vrot.lane.b32.xlu0 %v2504_v3, %s2667_s4 }
 0x2c0   :  { %v2506_v4 = vpop.eup %2505 }
 0x2c1   :  { %1166 = vrot.lane.b32.xlu1 %v2506_v4, %s2667_s4 }
 0x32f   :  { %v1165_v5 = vpop.permute.xlu0 %1164 }
 0x330   :  { %v1170_v7 = vmul.f32 %v2500_v49, %v1165_v5  ;;  %v899_v49 = vld [vmem:[#allocation2 + $0x38] sm:$0xff] }
 0x331   :  { %v911_v50 = vpack.c.bf16 %v899_v49, %v898_v47 }
 0x333   :  { %v1167_v6 = vpop.permute.xlu1 %1166  ;;  %2399 = vmatmul.mubr.msk.bf16.gmra.mrb[4].mxu0 %vm841_vm0, %v911_v50 }
 0x334   :  { %v1171_v8 = vmul.f32 %v2502_v51, %v1167_v6 }
 0x336   :  { %v1172_v9 = vpack.c.bf16 %v1171_v8, %v1170_v7 }
 0x338   :  { %1174 = vrot.lane.b32.xlu0 %v1172_v9, %s2668_s29 }
 0x3aa   :  { %v1175_v10 = vpop.permute.xlu0 %1174 }
 0x3ab   :  { %2423 = vmatmul.mubr.msk.bf16.vlgmr.msra.gmra.mrb[4].mxu1 %vm841_vm0, %v1175_v10 }
 0x3ac   :  { %2427 = vmatpush3.bf16.msra.mxu1 %v2814_v20  ;;  %2430 = vmatprep.mubr.msk.bf16.mxu1 %vm2665_vm2, %v2664_v18 }
 0x3ad   :  { %2428 = vmatprep.subr.bf16.mxu1 %v2664_v18 }
 0x3b0   :  { %2429 = vmatpush3.bf16.msra.mxu1 %v2823_v22 }
 0x3b1   :  { %2434 = vmatprep.subr.bf16.mxu1 %v2664_v18 }
 0x406   :  { %v2882_v58 = vpop.f32.mrb[4].mxu0 }
 0x407   :  { %v1013_v59 = vpop.f32.mrb[5].mxu0 }
 0x408   :  { %v2884_v60 = vpop.f32.mrb[6].mxu0  ;;  %v1014_v63 = vadd.f32 %v2844_v30, %v1013_v59 }
 0x409   :  { %v1025_v45 = vadd.f32 %v2884_v60, %v2844_v30 }
 0x47e   :  { %v1213_v12 = vpop.f32.mrb[4].mxu1 }
 0x47f   :  { %v1220_v14 = vadd.f32 %v1213_v12, %v1006_v11  ;;  %v2424_v15 = vpop.f32.mrb[5].mxu1 }
 0x480   :  { %v1216_v16 = vpop.f32.mrb[6].mxu1 }
 0x481   :  { %v2300_v17 = vmul.f32 -1.442695, %v1220_v14  ;;  %v1221_v19 = vadd.f32 %v1216_v16, %v1009_v13  ;;  %v2425_v21 = vpop.f32.mrb[7].mxu1 }
 0x483   :  { %2507 = vpow2.f32 %v2300_v17  ;;  %v2301_v23 = vmul.f32 -1.442695, %v1221_v19 }
 0x485   :  { %2509 = vpow2.f32 %v2301_v23 }
 0x48d   :  { %v2508_v24 = vpop.eup %2507 }
 0x48e   :  { %v1228_v25 = vadd.f32 1.0, %v2508_v24 }
 0x48f   :  { %v2510_v26 = vpop.eup %2509 }
 0x490   :  { %2511 = vrcp.f32 %v1228_v25  ;;  %v1229_v27 = vadd.f32 1.0, %v2510_v26 }
 0x492   :  { %2513 = vrcp.f32 %v1229_v27 }
 0x49a   :  { %v2512_v28 = vpop.eup %2511 }
 0x49b   :  { %v1234_v29 = vmul.f32 2.0, %v2512_v28  ;;  %v1238_v39 = vmul.f32 %v2512_v28, %v1158_v61  ;;  %v1016_v61 = vpop.f32.mrb[7].mxu0 }
 0x49c   :  { %v2514_v31 = vpop.eup %2513  ;;  %v1017_v3 = vadd.f32 %v2844_v30, %v1016_v61 }
 0x49d   :  { %v2302_v32 = vadd.f32 -1.0, %v1234_v29  ;;  %v1235_v33 = vmul.f32 2.0, %v2514_v31  ;;  %v1239_v42 = vmul.f32 %v2514_v31, %v1159_v2 }
 0x49f   :  { %1242 = vrot.lane.b32.xlu1 %v2302_v32, %s2667_s4  ;;  %v2303_v34 = vadd.f32 -1.0, %v1235_v33 }
 0x4a1   :  { %1244 = vrot.lane.b32.xlu0 %v2303_v34, %s2667_s4 }
 0x511   :  { %v1243_v35 = vpop.permute.xlu1 %1242 }
 0x512   :  { %v1248_v36 = vmul.f32 %v2512_v28, %v1243_v35 }
 0x513   :  { %v1245_v37 = vpop.permute.xlu0 %1244 }
 0x514   :  { %v1249_v38 = vmul.f32 %v2514_v31, %v1245_v37  ;;  %1252 = vrot.lane.b32.xlu1 %v1248_v36, %s2668_s29 }
 0x516   :  { %1254 = vrot.lane.b32.xlu0 %v1249_v38, %s2668_s29 }
 0x586   :  { %v1253_v40 = vpop.permute.xlu1 %1252 }
 0x587   :  { %v2871_v41 = vadd.f32 %v1253_v40, %v1238_v39 }
 0x588   :  { %v1255_v43 = vpop.permute.xlu0 %1254 }
 0x589   :  { %2515 = vtanh.f32 %v2871_v41  ;;  %v2874_v44 = vadd.f32 %v1255_v43, %v1239_v42  ;;  %v1022_v43 = vadd.f32 %v2882_v58, %v2844_v30 }
 0x58b   :  { %2517 = vtanh.f32 %v2874_v44 }
 0x593   :  { %v2516_v51 = vpop.eup %2515 }
 0x594   :  { %1264 = vrot.lane.b32.xlu1 %v2516_v51, %s2667_s4 }
 0x595   :  { %v2518_v52 = vpop.eup %2517 }
 0x596   :  { %1266 = vrot.lane.b32.xlu0 %v2518_v52, %s2667_s4 }
 0x606   :  { %v1265_v53 = vpop.permute.xlu1 %1264 }
 0x607   :  { %v1270_v55 = vmul.f32 %v2512_v28, %v1265_v53 }
 0x608   :  { %v1267_v54 = vpop.permute.xlu0 %1266 }
 0x609   :  { %v1271_v56 = vmul.f32 %v2514_v31, %v1267_v54 }
 0x60b   :  { %v1272_v57 = vpack.c.bf16 %v1271_v56, %v1270_v55 }
 0x60d   :  { %1274 = vrot.lane.b32.xlu1 %v1272_v57, %s2668_s29 }
 0x67f   :  { %v1275_v62 = vpop.permute.xlu1 %1274 }
 0x680   :  { %2431 = vmatmul.mubr.msk.bf16.vlgmr.msra.gmra.mrb[8].mxu1 %vm841_vm0, %v1275_v62 }
 0x681   :  { %2435 = vmatpush3.bf16.msra.mxu1 %v2814_v20  ;;  %2438 = vmatprep.mubr.msk.bf16.mxu1 %vm2665_vm2, %v2664_v18 }
 0x682   :  { %2436 = vmatprep.subr.bf16.mxu1 %v2664_v18 }
 0x685   :  { %2437 = vmatpush3.bf16.msra.mxu1 %v2823_v22 }
 0x686   :  { %2450 = vmatprep.subr.bf16.mxu1 %v2664_v18 }
 0x753   :  { %v1313_v2 = vpop.f32.mrb[8].mxu1 }
 0x754   :  { %v1320_v4 = vadd.f32 %v1313_v2, %v1014_v63  ;;  %v2432_v5 = vpop.f32.mrb[9].mxu1 }
 0x755   :  { %v1316_v6 = vpop.f32.mrb[10].mxu1 }
 0x756   :  { %v2305_v7 = vmul.f32 -1.442695, %v1320_v4  ;;  %v1321_v8 = vadd.f32 %v1316_v6, %v1017_v3  ;;  %v2433_v9 = vpop.f32.mrb[11].mxu1 }
 0x758   :  { %2519 = vpow2.f32 %v2305_v7  ;;  %v2306_v10 = vmul.f32 -1.442695, %v1321_v8 }
 0x75a   :  { %2521 = vpow2.f32 %v2306_v10 }
 0x762   :  { %v2520_v11 = vpop.eup %2519 }
 0x763   :  { %v1328_v12 = vadd.f32 1.0, %v2520_v11  ;;  %v900_v11 = vld [vmem:[#allocation2 + $0x40] sm:$0xff] }
 0x764   :  { %v2522_v13 = vpop.eup %2521 }
 0x765   :  { %2523 = vrcp.f32 %v1328_v12  ;;  %v1329_v14 = vadd.f32 1.0, %v2522_v13  ;;  %v901_v12 = vld [vmem:[#allocation2 + $0x48] sm:$0xff]  ;;  %v902_v13 = vld [vmem:[#allocation2 + $0x50] sm:$0xff] }
 0x767   :  { %2525 = vrcp.f32 %v1329_v14  ;;  %v912_v14 = vpack.c.bf16 %v901_v12, %v900_v11 }
 0x769   :  { %2402 = vmatprep.mubr.msk.bf16.mxu0 %vm841_vm0, %v912_v14 }
 0x76f   :  { %v2524_v15 = vpop.eup %2523 }
 0x770   :  { %v1334_v16 = vmul.f32 2.0, %v2524_v15  ;;  %v1338_v28 = vmul.f32 %v2524_v15, %v2871_v41 }
 0x771   :  { %v2526_v17 = vpop.eup %2525 }
 0x772   :  { %v2307_v19 = vadd.f32 -1.0, %v1334_v16  ;;  %v1335_v21 = vmul.f32 2.0, %v2526_v17  ;;  %v1339_v32 = vmul.f32 %v2526_v17, %v2874_v44  ;;  %v904_v16 = vld [vmem:[#allocation2 + $0x60] sm:$0xff] }
 0x774   :  { %1342 = vrot.lane.b32.xlu0 %v2307_v19, %s2667_s4  ;;  %v2308_v23 = vadd.f32 -1.0, %v1335_v21 }
 0x776   :  { %1344 = vrot.lane.b32.xlu1 %v2308_v23, %s2667_s4  ;;  %v906_v23 = vld [vmem:[#allocation2 + $0x70] sm:$0xff] }
 0x7e6   :  { %v1343_v24 = vpop.permute.xlu0 %1342 }
 0x7e7   :  { %v1348_v25 = vmul.f32 %v2524_v15, %v1343_v24  ;;  %v907_v24 = vld [vmem:[#allocation2 + $0x78] sm:$0xff] }
 0x7e8   :  { %v1345_v26 = vpop.permute.xlu1 %1344 }
 0x7e9   :  { %v1349_v27 = vmul.f32 %v2526_v17, %v1345_v26  ;;  %1352 = vrot.lane.b32.xlu0 %v1348_v25, %s2668_s29 }
 0x7eb   :  { %1354 = vrot.lane.b32.xlu1 %v1349_v27, %s2668_s29  ;;  %v915_v27 = vpack.c.bf16 %v907_v24, %v906_v23 }
 0x85b   :  { %v1353_v29 = vpop.permute.xlu0 %1352 }
 0x85c   :  { %v1358_v31 = vadd.f32 %v1353_v29, %v1338_v28 }
 0x85d   :  { %v1355_v33 = vpop.permute.xlu1 %1354 }
 0x85e   :  { %2527 = vtanh.f32 %v1358_v31  ;;  %v1359_v34 = vadd.f32 %v1355_v33, %v1339_v32 }
 0x860   :  { %2529 = vtanh.f32 %v1359_v34 }
 0x868   :  { %v2528_v35 = vpop.eup %2527 }
 0x869   :  { %1364 = vrot.lane.b32.xlu0 %v2528_v35, %s2667_s4 }
 0x86a   :  { %v2530_v36 = vpop.eup %2529 }
 0x86b   :  { %1366 = vrot.lane.b32.xlu1 %v2530_v36, %s2667_s4 }
 0x8db   :  { %v1365_v37 = vpop.permute.xlu0 %1364 }
 0x8dc   :  { %v1370_v39 = vmul.f32 %v2524_v15, %v1365_v37  ;;  %v903_v15 = vld [vmem:[#allocation2 + $0x58] sm:$0xff] }
 0x8dd   :  { %v1367_v38 = vpop.permute.xlu1 %1366  ;;  %v913_v19 = vpack.c.bf16 %v903_v15, %v902_v13 }
 0x8de   :  { %v1371_v40 = vmul.f32 %v2526_v17, %v1367_v38  ;;  %v905_v17 = vld [vmem:[#allocation2 + $0x68] sm:$0xff] }
 0x8df   :  { %v914_v21 = vpack.c.bf16 %v905_v17, %v904_v16  ;;  %2403 = vmatmul.mubr.msk.bf16.gmra.mrb[8].mxu0 %vm841_vm0, %v913_v19 }
 0x8e0   :  { %v1372_v42 = vpack.c.bf16 %v1371_v40, %v1370_v39 }
 0x8e1   :  { %2406 = vmatprep.mubr.msk.bf16.mxu0 %vm841_vm0, %v914_v21 }
 0x8e2   :  { %1374 = vrot.lane.b32.xlu0 %v1372_v42, %s2668_s29 }
 0x8e7   :  { %2407 = vmatmul.mubr.msk.bf16.gmra.mrb[12].mxu0 %vm841_vm0, %v915_v27 }
 0x8e8   :  { %2446 = vmatprep.mubr.msk.bf16.mxu0 %vm2665_vm2, %v2664_v18 }
 0x954   :  { %v1375_v41 = vpop.permute.xlu0 %1374 }
 0x955   :  { %2439 = vmatmul.mubr.msk.bf16.vlgmr.msra.gmra.mrb[12].mxu1 %vm841_vm0, %v1375_v41 }
 0x956   :  { %2451 = vmatpush3.bf16.msra.mxu1 %v2814_v20  ;;  %2454 = vmatprep.mubr.msk.bf16.mxu1 %vm2665_vm2, %v2664_v18 }
 0x957   :  { %2452 = vmatprep.subr.bf16.mxu1 %v2664_v18 }
 0x95a   :  { %2453 = vmatpush3.bf16.msra.mxu1 %v2823_v22 }
 0x95b   :  { %2466 = vmatprep.subr.bf16.mxu1 %v2664_v18 }
 0xa28   :  { %v1413_v44 = vpop.f32.mrb[12].mxu1 }
 0xa29   :  { %v1420_v46 = vadd.f32 %v1413_v44, %v1022_v43  ;;  %v2440_v47 = vpop.f32.mrb[13].mxu1 }
 0xa2a   :  { %v1416_v48 = vpop.f32.mrb[14].mxu1 }
 0xa2b   :  { %v2310_v49 = vmul.f32 -1.442695, %v1420_v46  ;;  %v1421_v50 = vadd.f32 %v1416_v48, %v1025_v45  ;;  %v2441_v51 = vpop.f32.mrb[15].mxu1 }
 0xa2d   :  { %2531 = vpow2.f32 %v2310_v49  ;;  %v2311_v52 = vmul.f32 -1.442695, %v1421_v50 }
 0xa2f   :  { %2533 = vpow2.f32 %v2311_v52 }
 0xa37   :  { %v2532_v53 = vpop.eup %2531 }
 0xa38   :  { %v1428_v54 = vadd.f32 1.0, %v2532_v53 }
 0xa39   :  { %v2534_v55 = vpop.eup %2533 }
 0xa3a   :  { %2535 = vrcp.f32 %v1428_v54  ;;  %v1429_v56 = vadd.f32 1.0, %v2534_v55 }
 0xa3c   :  { %2537 = vrcp.f32 %v1429_v56 }
 0xa44   :  { %v2536_v57 = vpop.eup %2535 }
 0xa45   :  { %v1434_v58 = vmul.f32 2.0, %v2536_v57  ;;  %v1438_v5 = vmul.f32 %v2536_v57, %v1358_v31 }
 0xa46   :  { %v2538_v59 = vpop.eup %2537 }
 0xa47   :  { %v2312_v61 = vadd.f32 -1.0, %v1434_v58  ;;  %v1435_v60 = vmul.f32 2.0, %v2538_v59  ;;  %v1439_v8 = vmul.f32 %v2538_v59, %v1359_v34  ;;  %v2934_v34 = vpop.f32.mrb[8].mxu0 }
 0xa48   :  { %v1029_v35 = vpop.f32.mrb[9].mxu0 }
 0xa49   :  { %1442 = vrot.lane.b32.xlu1 %v2312_v61, %s2667_s4  ;;  %v2313_v62 = vadd.f32 -1.0, %v1435_v60  ;;  %v2936_v36 = vpop.f32.mrb[10].mxu0  ;;  %v1030_v43 = vadd.f32 %v2844_v30, %v1029_v35 }
 0xa4a   :  { %v1032_v37 = vpop.f32.mrb[11].mxu0  ;;  %v1041_v24 = vadd.f32 %v2936_v36, %v2844_v30 }
 0xa4b   :  { %1444 = vrot.lane.b32.xlu0 %v2313_v62, %s2667_s4  ;;  %v2938_v38 = vpop.f32.mrb[12].mxu0  ;;  %v1033_v45 = vadd.f32 %v2844_v30, %v1032_v37 }
 0xa4c   :  { %v2940_v39 = vpop.f32.mrb[13].mxu0 }
 0xa4d   :  { %v2942_v40 = vpop.f32.mrb[14].mxu0 }
 0xa4e   :  { %v2944_v42 = vpop.f32.mrb[15].mxu0 }
 0xabb   :  { %v1443_v63 = vpop.permute.xlu1 %1442 }
 0xabc   :  { %v1448_v2 = vmul.f32 %v2536_v57, %v1443_v63 }
 0xabd   :  { %v1445_v3 = vpop.permute.xlu0 %1444 }
 0xabe   :  { %v1449_v4 = vmul.f32 %v2538_v59, %v1445_v3  ;;  %1452 = vrot.lane.b32.xlu1 %v1448_v2, %s2668_s29 }
 0xac0   :  { %1454 = vrot.lane.b32.xlu0 %v1449_v4, %s2668_s29 }
 0xb30   :  { %v1453_v6 = vpop.permute.xlu1 %1452 }
 0xb31   :  { %v2919_v7 = vadd.f32 %v1453_v6, %v1438_v5 }
 0xb32   :  { %v1455_v9 = vpop.permute.xlu0 %1454 }
 0xb33   :  { %2539 = vtanh.f32 %v2919_v7  ;;  %v2922_v10 = vadd.f32 %v1455_v9, %v1439_v8 }
 0xb35   :  { %2541 = vtanh.f32 %v2922_v10 }
 0xb3d   :  { %v2540_v25 = vpop.eup %2539 }
 0xb3e   :  { %1464 = vrot.lane.b32.xlu1 %v2540_v25, %s2667_s4 }
 0xb3f   :  { %v2542_v26 = vpop.eup %2541 }
 0xb40   :  { %1466 = vrot.lane.b32.xlu0 %v2542_v26, %s2667_s4 }
 0xbb0   :  { %v1465_v28 = vpop.permute.xlu1 %1464 }
 0xbb1   :  { %v1470_v31 = vmul.f32 %v2536_v57, %v1465_v28 }
 0xbb2   :  { %v1467_v29 = vpop.permute.xlu0 %1466 }
 0xbb3   :  { %v1471_v32 = vmul.f32 %v2538_v59, %v1467_v29 }
 0xbb5   :  { %v1472_v33 = vpack.c.bf16 %v1471_v32, %v1470_v31 }
 0xbb7   :  { %1474 = vrot.lane.b32.xlu1 %v1472_v33, %s2668_s29 }
 0xc29   :  { %v1475_v41 = vpop.permute.xlu1 %1474 }
 0xc2a   :  { %2447 = vmatmul.mubr.msk.bf16.vlgmr.msra.gmra.mrb[16].mxu0 %vm841_vm0, %v1475_v41 }
 0xc2b   :  { %2459 = vmatpush3.bf16.msra.mxu0 %v2814_v20  ;;  %2462 = vmatprep.mubr.msk.bf16.mxu0 %vm2665_vm2, %v2664_v18 }
 0xc2c   :  { %2460 = vmatprep.subr.bf16.mxu0 %v2664_v18 }
 0xc2f   :  { %2461 = vmatpush3.bf16.msra.mxu0 %v2823_v22 }
 0xc30   :  { %2474 = vmatprep.subr.bf16.mxu0 %v2664_v18 }
 0xcfd   :  { %v1513_v44 = vpop.f32.mrb[16].mxu0 }
 0xcfe   :  { %v1520_v46 = vadd.f32 %v1513_v44, %v1030_v43  ;;  %v2448_v47 = vpop.f32.mrb[17].mxu0 }
 0xcff   :  { %v1516_v48 = vpop.f32.mrb[18].mxu0 }
 0xd00   :  { %v2315_v49 = vmul.f32 -1.442695, %v1520_v46  ;;  %v1521_v50 = vadd.f32 %v1516_v48, %v1033_v45  ;;  %v2449_v51 = vpop.f32.mrb[19].mxu0 }
 0xd02   :  { %2543 = vpow2.f32 %v2315_v49  ;;  %v2316_v52 = vmul.f32 -1.442695, %v1521_v50 }
 0xd04   :  { %2545 = vpow2.f32 %v2316_v52 }
 0xd0c   :  { %v2544_v53 = vpop.eup %2543 }
 0xd0d   :  { %v1528_v54 = vadd.f32 1.0, %v2544_v53 }
 0xd0e   :  { %v2546_v55 = vpop.eup %2545 }
 0xd0f   :  { %2547 = vrcp.f32 %v1528_v54  ;;  %v1529_v56 = vadd.f32 1.0, %v2546_v55 }
 0xd11   :  { %2549 = vrcp.f32 %v1529_v56 }
 0xd19   :  { %v2548_v57 = vpop.eup %2547 }
 0xd1a   :  { %v1534_v58 = vmul.f32 2.0, %v2548_v57  ;;  %v1538_v5 = vmul.f32 %v2548_v57, %v2919_v7 }
 0xd1b   :  { %v2550_v59 = vpop.eup %2549 }
 0xd1c   :  { %v2317_v61 = vadd.f32 -1.0, %v1534_v58  ;;  %v1535_v60 = vmul.f32 2.0, %v2550_v59  ;;  %v1539_v9 = vmul.f32 %v2550_v59, %v2922_v10  ;;  %v1038_v10 = vadd.f32 %v2934_v34, %v2844_v30 }
 0xd1e   :  { %1542 = vrot.lane.b32.xlu0 %v2317_v61, %s2667_s4  ;;  %v2318_v62 = vadd.f32 -1.0, %v1535_v60 }
 0xd20   :  { %1544 = vrot.lane.b32.xlu1 %v2318_v62, %s2667_s4 }
 0xd90   :  { %v1543_v63 = vpop.permute.xlu0 %1542 }
 0xd91   :  { %v1548_v2 = vmul.f32 %v2548_v57, %v1543_v63  ;;  %v1046_v63 = vadd.f32 %v2844_v30, %v2940_v39 }
 0xd92   :  { %v1545_v3 = vpop.permute.xlu1 %1544 }
 0xd93   :  { %v1549_v4 = vmul.f32 %v2550_v59, %v1545_v3  ;;  %1552 = vrot.lane.b32.xlu0 %v1548_v2, %s2668_s29  ;;  %v1049_v3 = vadd.f32 %v2844_v30, %v2944_v42 }
 0xd95   :  { %1554 = vrot.lane.b32.xlu1 %v1549_v4, %s2668_s29 }
 0xe05   :  { %v1553_v6 = vpop.permute.xlu0 %1552 }
 0xe06   :  { %v1558_v8 = vadd.f32 %v1553_v6, %v1538_v5 }
 0xe07   :  { %v1555_v11 = vpop.permute.xlu1 %1554 }
 0xe08   :  { %2551 = vtanh.f32 %v1558_v8  ;;  %v1559_v12 = vadd.f32 %v1555_v11, %v1539_v9 }
 0xe0a   :  { %2553 = vtanh.f32 %v1559_v12 }
 0xe12   :  { %v2552_v13 = vpop.eup %2551 }
 0xe13   :  { %1564 = vrot.lane.b32.xlu0 %v2552_v13, %s2667_s4 }
 0xe14   :  { %v2554_v14 = vpop.eup %2553 }
 0xe15   :  { %1566 = vrot.lane.b32.xlu1 %v2554_v14, %s2667_s4 }
 0xe85   :  { %v1565_v15 = vpop.permute.xlu0 %1564 }
 0xe86   :  { %v1570_v17 = vmul.f32 %v2548_v57, %v1565_v15 }
 0xe87   :  { %v1567_v16 = vpop.permute.xlu1 %1566 }
 0xe88   :  { %v1571_v19 = vmul.f32 %v2550_v59, %v1567_v16 }
 0xe8a   :  { %v1572_v21 = vpack.c.bf16 %v1571_v19, %v1570_v17 }
 0xe8c   :  { %1574 = vrot.lane.b32.xlu0 %v1572_v21, %s2668_s29 }
 0xefe   :  { %v1575_v7 = vpop.permute.xlu0 %1574 }
 0xeff   :  { %2455 = vmatmul.mubr.msk.bf16.vlgmr.msra.gmra.mrb[16].mxu1 %vm841_vm0, %v1575_v7 }
 0xf00   :  { %2467 = vmatpush3.bf16.msra.mxu1 %v2814_v20  ;;  %2470 = vmatprep.mubr.msk.bf16.mxu1 %vm2665_vm2, %v2664_v18 }
 0xf01   :  { %2468 = vmatprep.subr.bf16.mxu1 %v2664_v18 }
 0xf04   :  { %2469 = vmatpush3.bf16.msra.mxu1 %v2823_v22 }
 0xfd2   :  { %v1613_v23 = vpop.f32.mrb[16].mxu1 }
 0xfd3   :  { %v1620_v25 = vadd.f32 %v1613_v23, %v1038_v10  ;;  %v2456_v26 = vpop.f32.mrb[17].mxu1 }
 0xfd4   :  { %v1616_v27 = vpop.f32.mrb[18].mxu1 }
 0xfd5   :  { %v2320_v28 = vmul.f32 -1.442695, %v1620_v25  ;;  %v1621_v29 = vadd.f32 %v1616_v27, %v1041_v24  ;;  %v2457_v20 = vpop.f32.mrb[19].mxu1 }
 0xfd7   :  { %2555 = vpow2.f32 %v2320_v28  ;;  %v2321_v31 = vmul.f32 -1.442695, %v1621_v29 }
 0xfd9   :  { %2557 = vpow2.f32 %v2321_v31 }
 0xfe1   :  { %v2556_v32 = vpop.eup %2555 }
 0xfe2   :  { %v1628_v33 = vadd.f32 1.0, %v2556_v32 }
 0xfe3   :  { %v2558_v35 = vpop.eup %2557 }
 0xfe4   :  { %2559 = vrcp.f32 %v1628_v33  ;;  %v1629_v22 = vadd.f32 1.0, %v2558_v35 }
 0xfe6   :  { %2561 = vrcp.f32 %v1629_v22 }
 0xfee   :  { %v2560_v34 = vpop.eup %2559 }
 0xfef   :  { %v1634_v37 = vmul.f32 2.0, %v2560_v34  ;;  %v1638_v49 = vmul.f32 %v2560_v34, %v1558_v8 }
 0xff0   :  { %v2562_v41 = vpop.eup %2561 }
 0xff1   :  { %v2322_v43 = vadd.f32 -1.0, %v1634_v37  ;;  %v1635_v36 = vmul.f32 2.0, %v2562_v41  ;;  %v1639_v52 = vmul.f32 %v2562_v41, %v1559_v12 }
 0xff3   :  { %1642 = vrot.lane.b32.xlu1 %v2322_v43, %s2667_s4  ;;  %v2323_v44 = vadd.f32 -1.0, %v1635_v36  ;;  %v1054_v36 = vadd.f32 %v2938_v38, %v2844_v30 }
 0xff5   :  { %1644 = vrot.lane.b32.xlu0 %v2323_v44, %s2667_s4 }
0x1065   :  { %v1643_v45 = vpop.permute.xlu1 %1642 }
0x1066   :  { %v1648_v46 = vmul.f32 %v2560_v34, %v1643_v45  ;;  %v1057_v45 = vadd.f32 %v2942_v40, %v2844_v30 }
0x1067   :  { %v1645_v47 = vpop.permute.xlu0 %1644 }
0x1068   :  { %v1649_v48 = vmul.f32 %v2562_v41, %v1645_v47  ;;  %1652 = vrot.lane.b32.xlu1 %v1648_v46, %s2668_s29 }
0x106a   :  { %1654 = vrot.lane.b32.xlu0 %v1649_v48, %s2668_s29 }
0x10da   :  { %v1653_v50 = vpop.permute.xlu1 %1652 }
0x10db   :  { %v1658_v51 = vadd.f32 %v1653_v50, %v1638_v49 }
0x10dc   :  { %v1655_v53 = vpop.permute.xlu0 %1654 }
0x10dd   :  { %2563 = vtanh.f32 %v1658_v51  ;;  %v1659_v54 = vadd.f32 %v1655_v53, %v1639_v52 }
0x10df   :  { %2565 = vtanh.f32 %v1659_v54 }
0x10e7   :  { %v2564_v55 = vpop.eup %2563 }
0x10e8   :  { %1664 = vrot.lane.b32.xlu1 %v2564_v55, %s2667_s4 }
0x10e9   :  { %v2566_v56 = vpop.eup %2565 }
0x10ea   :  { %1666 = vrot.lane.b32.xlu0 %v2566_v56, %s2667_s4 }
0x115a   :  { %v1665_v57 = vpop.permute.xlu1 %1664 }
0x115b   :  { %v1670_v59 = vmul.f32 %v2560_v34, %v1665_v57 }
0x115c   :  { %v1667_v58 = vpop.permute.xlu0 %1666 }
0x115d   :  { %v1671_v61 = vmul.f32 %v2562_v41, %v1667_v58 }
0x115f   :  { %v1672_v60 = vpack.c.bf16 %v1671_v61, %v1670_v59 }
0x1161   :  { %1674 = vrot.lane.b32.xlu1 %v1672_v60, %s2668_s29 }
0x11d3   :  { %v1675_v62 = vpop.permute.xlu1 %1674 }
0x11d4   :  { %2463 = vmatmul.mubr.msk.bf16.vlgmr.msra.gmra.mrb[20].mxu0 %vm841_vm0, %v1675_v62 }
0x11d5   :  { %2478 = vmatprep.mubr.msk.bf16.mxu0 %vm2665_vm2, %v2664_v18 }
0x12a7   :  { %v1713_v2 = vpop.f32.mrb[20].mxu0 }
0x12a8   :  { %v1720_v4 = vadd.f32 %v1713_v2, %v1046_v63  ;;  %v2464_v5 = vpop.f32.mrb[21].mxu0 }
0x12a9   :  { %v1716_v6 = vpop.f32.mrb[22].mxu0 }
0x12aa   :  { %v2325_v8 = vmul.f32 -1.442695, %v1720_v4  ;;  %v1721_v9 = vadd.f32 %v1716_v6, %v1049_v3  ;;  %v2465_v11 = vpop.f32.mrb[23].mxu0 }
0x12ac   :  { %2567 = vpow2.f32 %v2325_v8  ;;  %v2326_v12 = vmul.f32 -1.442695, %v1721_v9 }
0x12ae   :  { %2569 = vpow2.f32 %v2326_v12 }
0x12b6   :  { %v2568_v13 = vpop.eup %2567 }
0x12b7   :  { %v1728_v14 = vadd.f32 1.0, %v2568_v13 }
0x12b8   :  { %v2570_v15 = vpop.eup %2569 }
0x12b9   :  { %2571 = vrcp.f32 %v1728_v14  ;;  %v1729_v16 = vadd.f32 1.0, %v2570_v15 }
0x12bb   :  { %2573 = vrcp.f32 %v1729_v16 }
0x12c3   :  { %v2572_v39 = vpop.eup %2571 }
0x12c4   :  { %v1734_v17 = vmul.f32 2.0, %v2572_v39  ;;  %v1738_v26 = vmul.f32 %v2572_v39, %v1658_v51 }
0x12c5   :  { %v2574_v19 = vpop.eup %2573 }
0x12c6   :  { %v2327_v21 = vadd.f32 -1.0, %v1734_v17  ;;  %v1735_v42 = vmul.f32 2.0, %v2574_v19  ;;  %v1739_v29 = vmul.f32 %v2574_v19, %v1659_v54 }
0x12c8   :  { %1742 = vrot.lane.b32.xlu0 %v2327_v21, %s2667_s4  ;;  %v2328_v7 = vadd.f32 -1.0, %v1735_v42 }
0x12ca   :  { %1744 = vrot.lane.b32.xlu1 %v2328_v7, %s2667_s4 }
0x133a   :  { %v1743_v10 = vpop.permute.xlu0 %1742 }
0x133b   :  { %v1748_v23 = vmul.f32 %v2572_v39, %v1743_v10 }
0x133c   :  { %v1745_v24 = vpop.permute.xlu1 %1744 }
0x133d   :  { %v1749_v25 = vmul.f32 %v2574_v19, %v1745_v24  ;;  %1752 = vrot.lane.b32.xlu0 %v1748_v23, %s2668_s29 }
0x133f   :  { %1754 = vrot.lane.b32.xlu1 %v1749_v25, %s2668_s29 }
0x13af   :  { %v1753_v27 = vpop.permute.xlu0 %1752 }
0x13b0   :  { %v1758_v28 = vadd.f32 %v1753_v27, %v1738_v26 }
0x13b1   :  { %v1755_v20 = vpop.permute.xlu1 %1754 }
0x13b2   :  { %2575 = vtanh.f32 %v1758_v28  ;;  %v1759_v31 = vadd.f32 %v1755_v20, %v1739_v29 }
0x13b4   :  { %2577 = vtanh.f32 %v1759_v31 }
0x13bc   :  { %v2576_v32 = vpop.eup %2575 }
0x13bd   :  { %1764 = vrot.lane.b32.xlu0 %v2576_v32, %s2667_s4 }
0x13be   :  { %v2578_v33 = vpop.eup %2577 }
0x13bf   :  { %1766 = vrot.lane.b32.xlu1 %v2578_v33, %s2667_s4 }
0x142f   :  { %v1765_v35 = vpop.permute.xlu0 %1764 }
0x1430   :  { %v1770_v34 = vmul.f32 %v2572_v39, %v1765_v35 }
0x1431   :  { %v1767_v22 = vpop.permute.xlu1 %1766 }
0x1432   :  { %v1771_v37 = vmul.f32 %v2574_v19, %v1767_v22 }
0x1434   :  { %v1772_v41 = vpack.c.bf16 %v1771_v37, %v1770_v34 }
0x1436   :  { %1774 = vrot.lane.b32.xlu0 %v1772_v41, %s2668_s29 }
0x14a8   :  { %v1775_v43 = vpop.permute.xlu0 %1774 }
0x14a9   :  { %2471 = vmatmul.mubr.msk.bf16.vlgmr.msra.gmra.mrb[20].mxu1 %vm841_vm0, %v1775_v43 }
0x157c   :  { %v1813_v44 = vpop.f32.mrb[20].mxu1 }
0x157d   :  { %v1820_v46 = vadd.f32 %v1813_v44, %v1054_v36  ;;  %v2472_v47 = vpop.f32.mrb[21].mxu1 }
0x157e   :  { %v1816_v48 = vpop.f32.mrb[22].mxu1 }
0x157f   :  { %v2330_v49 = vmul.f32 -1.442695, %v1820_v46  ;;  %v1821_v50 = vadd.f32 %v1816_v48, %v1057_v45  ;;  %v2473_v51 = vpop.f32.mrb[23].mxu1 }
0x1581   :  { %2579 = vpow2.f32 %v2330_v49  ;;  %v2331_v52 = vmul.f32 -1.442695, %v1821_v50 }
0x1583   :  { %2581 = vpow2.f32 %v2331_v52 }
0x158b   :  { %v2580_v53 = vpop.eup %2579 }
0x158c   :  { %v1828_v54 = vadd.f32 1.0, %v2580_v53 }
0x158d   :  { %v2582_v55 = vpop.eup %2581 }
0x158e   :  { %2583 = vrcp.f32 %v1828_v54  ;;  %v1829_v56 = vadd.f32 1.0, %v2582_v55 }
0x1590   :  { %2585 = vrcp.f32 %v1829_v56 }
0x1598   :  { %v2584_v38 = vpop.eup %2583 }
0x1599   :  { %v1834_v57 = vmul.f32 2.0, %v2584_v38  ;;  %v1838_v2 = vmul.f32 %v2584_v38, %v1758_v28 }
0x159a   :  { %v2586_v58 = vpop.eup %2585 }
0x159b   :  { %v2332_v59 = vadd.f32 -1.0, %v1834_v57  ;;  %v1835_v30 = vmul.f32 2.0, %v2586_v58  ;;  %v1839_v5 = vmul.f32 %v2586_v58, %v1759_v31 }
0x159d   :  { %1842 = vrot.lane.b32.xlu1 %v2332_v59, %s2667_s4  ;;  %v2333_v40 = vadd.f32 -1.0, %v1835_v30 }
0x159f   :  { %1844 = vrot.lane.b32.xlu0 %v2333_v40, %s2667_s4 }
0x160f   :  { %v1843_v61 = vpop.permute.xlu1 %1842 }
0x1610   :  { %v1848_v60 = vmul.f32 %v2584_v38, %v1843_v61 }
0x1611   :  { %v1845_v62 = vpop.permute.xlu0 %1844 }
0x1612   :  { %v1849_v63 = vmul.f32 %v2586_v58, %v1845_v62  ;;  %1852 = vrot.lane.b32.xlu1 %v1848_v60, %s2668_s29 }
0x1614   :  { %1854 = vrot.lane.b32.xlu0 %v1849_v63, %s2668_s29 }
0x1684   :  { %v1853_v3 = vpop.permute.xlu1 %1852 }
0x1685   :  { %v1858_v4 = vadd.f32 %v1853_v3, %v1838_v2 }
0x1686   :  { %v1855_v6 = vpop.permute.xlu0 %1854 }
0x1687   :  { %2587 = vtanh.f32 %v1858_v4  ;;  %v1859_v8 = vadd.f32 %v1855_v6, %v1839_v5 }
0x1689   :  { %2589 = vtanh.f32 %v1859_v8 }
0x1691   :  { %v2588_v9 = vpop.eup %2587 }
0x1692   :  { %1864 = vrot.lane.b32.xlu1 %v2588_v9, %s2667_s4 }
0x1693   :  { %v2590_v11 = vpop.eup %2589 }
0x1694   :  { %1866 = vrot.lane.b32.xlu0 %v2590_v11, %s2667_s4 }
0x1704   :  { %v1865_v12 = vpop.permute.xlu1 %1864 }
0x1705   :  { %v1870_v13 = vmul.f32 %v2584_v38, %v1865_v12 }
0x1706   :  { %v1867_v14 = vpop.permute.xlu0 %1866 }
0x1707   :  { %v1871_v15 = vmul.f32 %v2586_v58, %v1867_v14 }
0x1709   :  { %v1876_v16 = vpack.c.bf16 %v1871_v15, %v1870_v13 }
0x170a   :  { %2659 = dma.done.wait [#allocation5], 256 }
0x170b   :  { %2660 = vsyncadd [#allocation5], 4294967040  ;;  %2475 = vmatpush3.bf16.msra.mxu0 %v2718_v0  ;;  %1887 = vrot.lane.b32.xlu0 %v1876_v16, %s2668_s29  ;;  %v2334_v17 = vld [vmem:[%s3032_s6] ss:$0 sm:$0xff]  ;;  %s2669_s8 = smov [#allocation8]  }
0x170c   :  { %2476 = vmatprep.subr.bf16.mxu0 %v2664_v18  ;;  %s1940_s9 = sshll.u32 %s2669_s8, 4  ;;  %s1941_s9 = int_to_ptr.vmem [resolvable:$true] %s1940_s9 }
0x170d   :  { %s2603_s10 = scalar_lea.vmem %s1941_s9, 256  ;;  %p2608_p6 = scmp.lt.s32.totalorder %s1941_s9, %s1941_s9 }
0x170e   :  { %p2604_p5 = scmp.ne.s32.totalorder %s1941_s9, %s2603_s10  ;;  %p2609_p7 = scmp.lt.s32.totalorder %s2603_s10, %s2603_s10 }
0x170f   :  { %2477 = vmatpush3.bf16.msra.mxu0 %v2723_v1 }
0x1710   :  { %p2610_p8 = por %p2609_p7, %p2608_p6 }
0x1712   :  { %p2611_p9 = pnand %p2610_p8, %p2604_p5 }
0x177d   :  { %v1888_v39 = vpop.permute.xlu0 %1887 }
0x177e   :  { %2479 = vmatmul.mubr.msk.bf16.vlgmr.msra.gmra.mrb[24].mxu0 %vm841_vm0, %v1888_v39 }
0x1851   :  { %v1926_v19 = vpop.f32.mrb[24].mxu0 }
0x1852   :  { %v1927_v21 = vadd.f32 %v2334_v17, %v1926_v19  ;;  %v2480_v42 = vpop.f32.mrb[25].mxu0 }
0x1853   :  { %v1929_v7 = vpop.f32.mrb[26].mxu0 }
0x1854   :  { %1933 = vst [vmem:[#allocation8] sm:$0xff] %v1927_v21  ;;  %v1930_v0 = vadd.f32 %v2334_v17, %v1929_v7  ;;  %v2481_v10 = vpop.f32.mrb[27].mxu0 }
0x1856   :  { %1934 = vst [vmem:[#allocation8 + $0x8] sm:$0xff] %v1930_v0 }
0x1857   :  { %2614 = shalt.err (!%p2611_p9)
}
0x1858   :  { %s2615_s12 = scalar_lea.hbm %s3033_s7, 256 }
0x1859   :  { %p2616_p10 = scmp.ne.s32.totalorder %s3033_s7, %s2615_s12  ;;  %p2619_p11 = scmp.lt.u32.totalorder %s2615_s12, %s3033_s7 }
0x185b   :  { %p2621_p12 = pnand %p2619_p11, %p2616_p10 }
0x185d   :  { %2624 = shalt.err (!%p2621_p12)
}
0x185e   :  { %s2670_s17 = smov 128   ;;  %s2671_s5 = smov 8  }
0x185f   :  { %1946 = dma.vmem_to_hbm [thread:$0]  %s1941_s9, 256, %s3033_s7, [#allocation9], %s2670_s17, %s2670_s17, %s2671_s5  }
0x1860   :  { %2661 = dma.done.wait [#allocation9], 256  }
0x1861   :  { %2662 = vsyncadd [#allocation9], 4294967040 }
0x1862   :  { %1950 = vsyncpa [#allocation9], 1 }
0x1863   :  { %1951 = vsyncmov [#allocation4] }
0x1866   :  { %s1952_s20 = vpop.sfrf %1951 }
0x1867   :  { %p2336_p13 = scmp.ne.s32.totalorder %s1952_s20, 0 }
0x1869   :  { %1956 = shalt.err (%p2336_p13)  }
0x186a   :  { %1958 = vsyncmov [#allocation4 + $0x1] }
0x186d   :  { %s1959_s21 = vpop.sfrf %1958 }
0x186e   :  { %p2337_p0 = scmp.ne.s32.totalorder %s1959_s21, 0 }
0x1870   :  { %1963 = shalt.err (%p2337_p0)  }
0x1871   :  { %1965 = vsyncmov [#allocation4 + $0x2] }
0x1874   :  { %s1966_s1 = vpop.sfrf %1965 }
0x1875   :  { %p2338_p1 = scmp.ne.s32.totalorder %s1966_s1, 0 }
0x1877   :  { %1970 = shalt.err (%p2338_p1)  }
0x1878   :  { %1972 = vsyncmov [#allocation4 + $0x3] }
0x187b   :  { %s1973_s22 = vpop.sfrf %1972 }
0x187c   :  { %p2339_p2 = scmp.ne.s32.totalorder %s1973_s22, 0 }
0x187e   :  { %1977 = shalt.err (%p2339_p2)  }
0x187f   :  { %1979 = vsyncmov [#allocation4 + $0x4] }
0x1882   :  { %s1980_s7 = vpop.sfrf %1979 }
0x1883   :  { %p2340_p3 = scmp.ne.s32.totalorder %s1980_s7, 0 }
0x1885   :  { %1984 = shalt.err (%p2340_p3)  }
0x1886   :  { %1986 = vsyncmov [#allocation4 + $0x5] }
0x1889   :  { %s1987_s23 = vpop.sfrf %1986 }
0x188a   :  { %p2341_p4 = scmp.ne.s32.totalorder %s1987_s23, 0 }
0x188c   :  { %1991 = shalt.err (%p2341_p4)  }
0x188d   :  { %1993 = vsyncmov [#allocation4 + $0x6] }
0x1890   :  { %s1994_s24 = vpop.sfrf %1993 }
0x1891   :  { %p2342_p5 = scmp.ne.s32.totalorder %s1994_s24, 0 }
0x1893   :  { %1998 = shalt.err (%p2342_p5)  }
0x1894   :  { %2000 = vsyncmov [#allocation4 + $0x7] }
0x1897   :  { %s2001_s25 = vpop.sfrf %2000 }
0x1898   :  { %p2343_p6 = scmp.ne.s32.totalorder %s2001_s25, 0 }
0x189a   :  { %2005 = shalt.err (%p2343_p6)  }
0x189b   :  { %2007 = vsyncmov [#allocation4 + $0x8] }
0x189e   :  { %s2008_s26 = vpop.sfrf %2007 }
0x189f   :  { %p2344_p7 = scmp.ne.s32.totalorder %s2008_s26, 0 }
0x18a1   :  { %2012 = shalt.err (%p2344_p7)  }
0x18a2   :  { %2014 = vsyncmov [#allocation4 + $0x9] }
0x18a5   :  { %s2015_s27 = vpop.sfrf %2014 }
0x18a6   :  { %p2345_p8 = scmp.ne.s32.totalorder %s2015_s27, 0 }
0x18a8   :  { %2019 = shalt.err (%p2345_p8)  }
0x18a9   :  { %2021 = vsyncmov [#allocation4 + $0xa] }
0x18ac   :  { %s2022_s28 = vpop.sfrf %2021 }
0x18ad   :  { %p2346_p9 = scmp.ne.s32.totalorder %s2022_s28, 0 }
0x18af   :  { %2026 = shalt.err (%p2346_p9)  }
0x18b0   :  { %2028 = vsyncmov [#allocation4 + $0xb] }
0x18b3   :  { %s2029_s2 = vpop.sfrf %2028 }
0x18b4   :  { %p2347_p10 = scmp.ne.s32.totalorder %s2029_s2, 0 }
0x18b6   :  { %2033 = shalt.err (%p2347_p10)  }
0x18b7   :  { %2035 = vsyncmov [#allocation4 + $0xc] }
0x18ba   :  { %s2036_s3 = vpop.sfrf %2035 }
0x18bb   :  { %p2348_p11 = scmp.ne.s32.totalorder %s2036_s3, 0 }
0x18bd   :  { %2040 = shalt.err (%p2348_p11)  }
0x18be   :  { %2042 = vsyncmov [#allocation4 + $0xd] }
0x18c1   :  { %s2043_s4 = vpop.sfrf %2042 }
0x18c2   :  { %p2349_p12 = scmp.ne.s32.totalorder %s2043_s4, 0 }
0x18c4   :  { %2047 = shalt.err (%p2349_p12)  }
0x18c5   :  { %2049 = vsyncmov [#allocation4 + $0xe] }
0x18c8   :  { %s2050_s29 = vpop.sfrf %2049 }
0x18c9   :  { %p2350_p13 = scmp.ne.s32.totalorder %s2050_s29, 0 }
0x18cb   :  { %2054 = shalt.err (%p2350_p13)  }
0x18cc   :  { %2056 = vsyncmov [#allocation4 + $0xf] }
0x18cf   :  { %s2057_s30 = vpop.sfrf %2056 }
0x18d0   :  { %p2351_p0 = scmp.ne.s32.totalorder %s2057_s30, 0 }
0x18d2   :  { %2061 = shalt.err (%p2351_p0)  }
0x18d3   :  { %2062 = vsyncmov [#allocation5] }
0x18d6   :  { %s2063_s0 = vpop.sfrf %2062 }
0x18d7   :  { %p2352_p1 = scmp.ne.s32.totalorder %s2063_s0, 0 }
0x18d9   :  { %2067 = shalt.err (%p2352_p1)  }

</bundles_post_ra>
